<compile_context>
chip_gen: v6e
topology: v6e:2x2x1
jax: 0.10.0
libtpu: 0.0.40
codegen_flags: <defaults>
</compile_context>

<pallas_src>
import functools

import jax
import jax.numpy as jnp
from jax import lax
from jax.experimental import pallas as pl
from jax.experimental.pallas import tpu as pltpu

_F32 = jnp.float32
_BF16 = jnp.bfloat16


def _layernorm(x, gamma, beta, eps=1e-5):
    mu = jnp.mean(x, axis=-1, keepdims=True)
    var = jnp.mean(jnp.square(x - mu), axis=-1, keepdims=True)
    return (x - mu) * lax.rsqrt(var + eps) * gamma + beta


def _xmt_block_kernel(q_ref, k_ref, v_ref,
                      wq_ref, bq_ref, wo_ref, bo_ref,
                      g1_ref, be1_ref,
                      w1_ref, b1_ref, w2_ref, b2_ref,
                      g2_ref, be2_ref,
                      o_ref,
                      attn_scratch,
                      *, n_heads, head_dim, ffn_chunk):
    # Residual / normalization path stays f32; all matmul operands are bf16
    # with f32 MXU accumulation.
    q = q_ref[...].astype(_F32)                       # (blk_q, D)
    q_bf = q.astype(_BF16)

    # Full-width Q projection (attention scale already folded into wq / bq).
    qall = (jnp.dot(q_bf, wq_ref[...], preferred_element_type=_F32)
            + bq_ref[...]).astype(_BF16)              # (blk_q, D)

    k = k_ref[...]                                    # (Lkv, D) bf16, precomputed
    v = v_ref[...]                                    # (Lkv, D) bf16, precomputed

    # Per-head scores / softmax / p@V; head outputs staged into the bf16
    # scratch at lane offset h*hd so the output projection is a single
    # full-width (blk_q, D) x (D, D) matmul.
    # TODO(synk): flash-style (online-softmax) Lkv tiling for very long kv.
    for h in range(n_heads):
        lo, hi = h * head_dim, (h + 1) * head_dim
        qh = qall[:, lo:hi]                           # (blk_q, hd) bf16
        kh = k[:, lo:hi]                              # (Lkv,  hd) bf16
        vh = v[:, lo:hi]                              # (Lkv,  hd) bf16

        s = jnp.einsum("qd,kd->qk", qh, kh,
                       preferred_element_type=_F32)   # (blk_q, Lkv), pre-scaled
        s = s - jnp.max(s, axis=-1, keepdims=True)
        e = jnp.exp(s)
        p = e * pl.reciprocal(jnp.sum(e, axis=-1, keepdims=True), approx=True)

        ho = jnp.dot(p.astype(_BF16), vh, preferred_element_type=_F32)
        attn_scratch[:, lo:hi] = ho.astype(_BF16)

    # Single full-width output projection.
    attn = (jnp.dot(attn_scratch[...], wo_ref[...],
                    preferred_element_type=_F32) + bo_ref[...])   # (blk_q, D)

    # Residual + LayerNorm 1.
    x = _layernorm(q + attn, g1_ref[...], be1_ref[...])
    x_bf = x.astype(_BF16)

    # FFN: Linear(D, 4D) -> ReLU -> (Dropout = identity) -> Linear(4D, D).
    # The hidden (4D) dimension is processed in chunks to bound the live
    # (blk_q, chunk) intermediate.
    hidden = w1_ref.shape[1]
    ffn = jnp.zeros(x.shape, _F32)
    for c0 in range(0, hidden, ffn_chunk):
        c1 = min(c0 + ffn_chunk, hidden)
        h1 = (jnp.dot(x_bf, w1_ref[:, c0:c1], preferred_element_type=_F32)
              + b1_ref[:, c0:c1])
        h1 = jnp.maximum(h1, 0.0)
        ffn = ffn + jnp.dot(h1.astype(_BF16), w2_ref[c0:c1, :],
                            preferred_element_type=_F32)
    ffn = ffn + b2_ref[...]

    # Residual + LayerNorm 2.
    y = _layernorm(x + ffn, g2_ref[...], be2_ref[...])
    o_ref[...] = y.astype(o_ref.dtype)


def prepare_params(torch_params, n_heads):
    """Host-side layout prep.

    Returns (kv_proj_params, kernel_params):
      kv_proj_params = (wk, bk, wv, bv)  -> used by the plain-XLA K/V precompute
      kernel_params  = (wq, bq, wo, bo, g1, be1, w1, b1, w2, b2, g2, be2)
    Weights are pre-transposed to (D_in, D_out) and cast to bf16; biases and
    LayerNorm params stay f32.  The 1/sqrt(head_dim) scale is folded into wq/bq.
    """
    (w_in, b_in, w_o, b_o, g1, be1, w1, b1, w2, b2, g2, be2) = torch_params
    D = w_o.shape[0]
    hd = D // n_heads
    scale = 1.0 / (hd ** 0.5)

    wq = (w_in[:D].T * scale).astype(_BF16)
    bq = (b_in[:D] * scale).reshape(1, D).astype(_F32)
    wk = w_in[D:2 * D].T.astype(_BF16)
    bk = b_in[D:2 * D].reshape(1, D).astype(_F32)
    wv = w_in[2 * D:].T.astype(_BF16)
    bv = b_in[2 * D:].reshape(1, D).astype(_F32)
    wo = w_o.T.astype(_BF16)
    bo = b_o.reshape(1, D).astype(_F32)

    kernel_params = (
        wq, bq, wo, bo,
        g1.reshape(1, D).astype(_F32), be1.reshape(1, D).astype(_F32),
        w1.T.astype(_BF16), b1.reshape(1, -1).astype(_F32),
        w2.T.astype(_BF16), b2.reshape(1, -1).astype(_F32),
        g2.reshape(1, D).astype(_F32), be2.reshape(1, D).astype(_F32),
    )
    kv_proj_params = (wk, bk, wv, bv)
    return kv_proj_params, kernel_params


def _default_vmem_limit():
    try:
        cap = pltpu.get_tpu_info().vmem_capacity_bytes
    except Exception:
        cap = 64 * 1024 * 1024
    # Leave headroom for compiler scratch; cap so huge-VMEM chips don't
    # over-reserve (v5e/v6e: ~96 MiB, v7x: ~48 MiB).
    return min(int(cap * 3 // 4), 100 * 1024 * 1024)


def shared_cross_modal_transformer_block(q, kv, kv_proj_params, kernel_params,
                                         n_heads, *, block_q=256,
                                         ffn_chunk=2048,
                                         single_buffer_weights=True):
    """q: (B, Lq, D), kv: (B, Lkv, D); params from prepare_params()."""
    B, Lq, D = q.shape
    _, Lkv, _ = kv.shape
    hd = D // n_heads
    blk_q = min(block_q, Lq)
    grid = (B, pl.cdiv(Lq, blk_q))

    # K / V projections computed once per batch (plain XLA), handed to the
    # kernel as resident bf16 tensors.
    wk, bk, wv, bv = kv_proj_params
    kv_bf = kv.astype(_BF16)
    k_proj = (jnp.dot(kv_bf, wk, preferred_element_type=_F32) + bk).astype(_BF16)
    v_proj = (jnp.dot(kv_bf, wv, preferred_element_type=_F32) + bv).astype(_BF16)

    hidden = kernel_params[6].shape[1]      # w1 is (D, 4D)
    chunk = min(ffn_chunk, hidden)

    q_spec = pl.BlockSpec((None, blk_q, D), lambda b, i: (b, i, 0))
    kv_spec = pl.BlockSpec((None, Lkv, D), lambda b, i: (b, 0, 0))
    out_spec = pl.BlockSpec((None, blk_q, D), lambda b, i: (b, i, 0))

    # Cost estimate: only work executed inside the kernel (K/V projections
    # happen outside).
    flops = int(2 * B * Lq * (2 * D * D          # Q projection + out projection
                              + 2 * Lkv * D      # scores + p @ V
                              + 8 * D * D))      # FFN (two D<->4D matmuls)
    transcendentals = int(B * n_heads * Lq * Lkv)
    param_bytes = sum(int(p.size) * p.dtype.itemsize for p in kernel_params)
    bytes_accessed = int(q.size * q.dtype.itemsize
                         + k_proj.size * k_proj.dtype.itemsize
                         + v_proj.size * v_proj.dtype.itemsize
                         + B * Lq * D * q.dtype.itemsize
                         + param_bytes)

    kernel = functools.partial(_xmt_block_kernel, n_heads=n_heads,
                               head_dim=hd, ffn_chunk=chunk)

    def build(use_buffered):
        def const_spec(arr):
            zeros = (0,) * arr.ndim
            if use_buffered:
                # Constant index map -> single-buffer the resident weights
                # (halves weight VMEM; matters on v7x's 64 MiB VMEM).
                return pl.BlockSpec(arr.shape, lambda b, i, _z=zeros: _z,
                                    pipeline_mode=pl.Buffered(1))
            return pl.BlockSpec(arr.shape, lambda b, i, _z=zeros: _z)

        in_specs = [q_spec, kv_spec, kv_spec] + [const_spec(p) for p in kernel_params]
        return pl.pallas_call(
            kernel,
            out_shape=jax.ShapeDtypeStruct((B, Lq, D), q.dtype),
            grid_spec=pltpu.PrefetchScalarGridSpec(
                num_scalar_prefetch=0,
                grid=grid,
                in_specs=in_specs,
                out_specs=out_spec,
                scratch_shapes=[pltpu.VMEM((blk_q, D), _BF16)],
            ),
            compiler_params=pltpu.CompilerParams(
                dimension_semantics=("parallel", "parallel"),
                vmem_limit_bytes=_default_vmem_limit()),
            cost_estimate=pl.CostEstimate(flops=flops,
                                          transcendentals=transcendentals,
                                          bytes_accessed=bytes_accessed),
        )

    args = (q, k_proj, v_proj) + tuple(kernel_params)
    if single_buffer_weights:
        try:
            return build(True)(*args)
        except Exception:
            pass  # fall back to default double-buffered weight blocks
    return build(False)(*args)


def init_params(key, dim):
    """PyTorch-convention parameters (y = x @ W^T + b)."""
    ks = jax.random.split(key, 8)
    s = 0.05
    w_in = jax.random.normal(ks[0], (3 * dim, dim), jnp.float32) * s
    b_in = jax.random.normal(ks[1], (3 * dim,), jnp.float32) * s
    w_o = jax.random.normal(ks[2], (dim, dim), jnp.float32) * s
    b_o = jax.random.normal(ks[3], (dim,), jnp.float32) * s
    g1 = jnp.ones((dim,), jnp.float32)
    be1 = jnp.zeros((dim,), jnp.float32)
    w1 = jax.random.normal(ks[4], (4 * dim, dim), jnp.float32) * s
    b1 = jax.random.normal(ks[5], (4 * dim,), jnp.float32) * s
    w2 = jax.random.normal(ks[6], (dim, 4 * dim), jnp.float32) * s
    b2 = jax.random.normal(ks[7], (dim,), jnp.float32) * s
    g2 = jnp.ones((dim,), jnp.float32)
    be2 = jnp.zeros((dim,), jnp.float32)
    return (w_in, b_in, w_o, b_o, g1, be1, w1, b1, w2, b2, g2, be2)


def reference(q, kv, params, n_heads):
    """Pure-JAX f32 reference of the PyTorch module's forward."""
    (w_in, b_in, w_o, b_o, g1, be1, w1, b1, w2, b2, g2, be2) = params
    B, Lq, D = q.shape
    hd = D // n_heads
    Q = q @ w_in[:D].T + b_in[:D]
    K = kv @ w_in[D:2 * D].T + b_in[D:2 * D]
    V = kv @ w_in[2 * D:].T + b_in[2 * D:]
    Qh = Q.reshape(B, Lq, n_heads, hd).transpose(0, 2, 1, 3)
    Kh = K.reshape(B, -1, n_heads, hd).transpose(0, 2, 1, 3)
    Vh = V.reshape(B, -1, n_heads, hd).transpose(0, 2, 1, 3)
    s = jnp.einsum("bhqd,bhkd->bhqk", Qh, Kh) / jnp.sqrt(hd)
    p = jax.nn.softmax(s, axis=-1)
    a = jnp.einsum("bhqk,bhkd->bhqd", p, Vh).transpose(0, 2, 1, 3).reshape(B, Lq, D)
    a = a @ w_o.T + b_o

    def ln(x, g, b):
        mu = x.mean(-1, keepdims=True)
        var = ((x - mu) ** 2).mean(-1, keepdims=True)
        return (x - mu) * lax.rsqrt(var + 1e-5) * g + b

    x = ln(q + a, g1, be1)
    f = jnp.maximum(x @ w1.T + b1, 0.0) @ w2.T + b2
    return ln(x + f, g2, be2)


if __name__ == "__main__":
    B, Lq, Lkv, D, H = 2, 8, 8, 32, 4
    key = jax.random.PRNGKey(0)
    kq, kkv, kp = jax.random.split(key, 3)
    q = jax.random.normal(kq, (B, Lq, D), jnp.float32)
    kv = jax.random.normal(kkv, (B, Lkv, D), jnp.float32)

    params = init_params(kp, D)                       # PyTorch-layout params
    kv_proj_params, kernel_params = prepare_params(params, H)

    out = shared_cross_modal_transformer_block(q, kv, kv_proj_params,
                                               kernel_params, H)
    out = jax.block_until_ready(out)

    ref = reference(q, kv, params, H)
    assert out.shape == (B, Lq, D) and out.dtype == q.dtype
    # bf16 matmul operands => loosened tolerance vs the f32 reference.
    assert jnp.allclose(out, ref, atol=3e-2, rtol=3e-2), "mismatch vs JAX reference"

    print("KERNEL_OK")
</pallas_src>

<mosaic_0001>
module attributes {stable_mosaic.version = 11 : i64} {
  func.func @_xmt_block_kernel(%arg0: i32, %arg1: i32, %arg2: memref<1x8x32xf32, #tpu.memory_space<vmem>>, %arg3: memref<1x8x32xbf16, #tpu.memory_space<vmem>>, %arg4: memref<1x8x32xbf16, #tpu.memory_space<vmem>>, %arg5: memref<32x32xbf16, #tpu.memory_space<vmem>>, %arg6: memref<1x32xf32, #tpu.memory_space<vmem>>, %arg7: memref<32x32xbf16, #tpu.memory_space<vmem>>, %arg8: memref<1x32xf32, #tpu.memory_space<vmem>>, %arg9: memref<1x32xf32, #tpu.memory_space<vmem>>, %arg10: memref<1x32xf32, #tpu.memory_space<vmem>>, %arg11: memref<32x128xbf16, #tpu.memory_space<vmem>>, %arg12: memref<1x128xf32, #tpu.memory_space<vmem>>, %arg13: memref<128x32xbf16, #tpu.memory_space<vmem>>, %arg14: memref<1x32xf32, #tpu.memory_space<vmem>>, %arg15: memref<1x32xf32, #tpu.memory_space<vmem>>, %arg16: memref<1x32xf32, #tpu.memory_space<vmem>>, %arg17: memref<1x8x32xf32, #tpu.memory_space<vmem>>, %arg18: memref<8x32xbf16, #tpu.memory_space<vmem>>) attributes {dimension_semantics = [#tpu.dimension_semantics<parallel>, #tpu.dimension_semantics<parallel>], iteration_bounds = array<i64: 2, 1>, scalar_prefetch = 0 : i64, scratch_operands = 1 : i64, tpu.core_type = #tpu.core_type<tc>, window_params = [{transform_indices = @transform_0, window_bounds = array<i64: 1, 8, 32>}, {transform_indices = @transform_1, window_bounds = array<i64: 1, 8, 32>}, {transform_indices = @transform_2, window_bounds = array<i64: 1, 8, 32>}, {pipeline_mode = #tpu.pipeline_mode<synchronous>, transform_indices = @transform_3, window_bounds = array<i64: 32, 32>}, {pipeline_mode = #tpu.pipeline_mode<synchronous>, transform_indices = @transform_4, window_bounds = array<i64: 1, 32>}, {pipeline_mode = #tpu.pipeline_mode<synchronous>, transform_indices = @transform_5, window_bounds = array<i64: 32, 32>}, {pipeline_mode = #tpu.pipeline_mode<synchronous>, transform_indices = @transform_6, window_bounds = array<i64: 1, 32>}, {pipeline_mode = #tpu.pipeline_mode<synchronous>, transform_indices = @transform_7, window_bounds = array<i64: 1, 32>}, {pipeline_mode = #tpu.pipeline_mode<synchronous>, transform_indices = @transform_8, window_bounds = array<i64: 1, 32>}, {pipeline_mode = #tpu.pipeline_mode<synchronous>, transform_indices = @transform_9, window_bounds = array<i64: 32, 128>}, {pipeline_mode = #tpu.pipeline_mode<synchronous>, transform_indices = @transform_10, window_bounds = array<i64: 1, 128>}, {pipeline_mode = #tpu.pipeline_mode<synchronous>, transform_indices = @transform_11, window_bounds = array<i64: 128, 32>}, {pipeline_mode = #tpu.pipeline_mode<synchronous>, transform_indices = @transform_12, window_bounds = array<i64: 1, 32>}, {pipeline_mode = #tpu.pipeline_mode<synchronous>, transform_indices = @transform_13, window_bounds = array<i64: 1, 32>}, {pipeline_mode = #tpu.pipeline_mode<synchronous>, transform_indices = @transform_14, window_bounds = array<i64: 1, 32>}, {transform_indices = @transform_15, window_bounds = array<i64: 1, 8, 32>}]} {
    %c0 = arith.constant 0 : index
    %c0_0 = arith.constant 0 : index
    %c0_1 = arith.constant 0 : index
    %0 = vector.load %arg2[%c0, %c0_0, %c0_1] : memref<1x8x32xf32, #tpu.memory_space<vmem>>, vector<1x8x32xf32>
    %1 = vector.shape_cast %0 : vector<1x8x32xf32> to vector<8x32xf32>
    %2 = arith.truncf %1 : vector<8x32xf32> to vector<8x32xbf16>
    %c0_2 = arith.constant 0 : index
    %c0_3 = arith.constant 0 : index
    %3 = vector.load %arg5[%c0_2, %c0_3] : memref<32x32xbf16, #tpu.memory_space<vmem>>, vector<32x32xbf16>
    %cst = arith.constant dense<0.000000e+00> : vector<8x32xf32>
    %4 = tpu.matmul %2, %3, %cst {dimension_numbers = #tpu.dot_dimension_numbers<[1], [0], [0], [1], [0, 0, 1, 1], [], []>} : vector<8x32xbf16>, vector<32x32xbf16>, vector<8x32xf32> -> vector<8x32xf32>
    %c0_4 = arith.constant 0 : index
    %c0_5 = arith.constant 0 : index
    %5 = vector.load %arg6[%c0_4, %c0_5] : memref<1x32xf32, #tpu.memory_space<vmem>>, vector<1x32xf32>
    %6 = vector.broadcast %5 : vector<1x32xf32> to vector<8x32xf32>
    %7 = arith.addf %4, %6 : vector<8x32xf32>
    %8 = arith.truncf %7 : vector<8x32xf32> to vector<8x32xbf16>
    %c0_6 = arith.constant 0 : index
    %c0_7 = arith.constant 0 : index
    %c0_8 = arith.constant 0 : index
    %9 = vector.load %arg3[%c0_6, %c0_7, %c0_8] : memref<1x8x32xbf16, #tpu.memory_space<vmem>>, vector<1x8x32xbf16>
    %10 = vector.shape_cast %9 : vector<1x8x32xbf16> to vector<8x32xbf16>
    %c0_9 = arith.constant 0 : index
    %c0_10 = arith.constant 0 : index
    %c0_11 = arith.constant 0 : index
    %11 = vector.load %arg4[%c0_9, %c0_10, %c0_11] : memref<1x8x32xbf16, #tpu.memory_space<vmem>>, vector<1x8x32xbf16>
    %12 = vector.shape_cast %11 : vector<1x8x32xbf16> to vector<8x32xbf16>
    %13 = vector.extract_strided_slice %8 {offsets = [0, 0], sizes = [8, 8], strides = [1, 1]} : vector<8x32xbf16> to vector<8x8xbf16>
    %14 = vector.extract_strided_slice %10 {offsets = [0, 0], sizes = [8, 8], strides = [1, 1]} : vector<8x32xbf16> to vector<8x8xbf16>
    %15 = vector.extract_strided_slice %12 {offsets = [0, 0], sizes = [8, 8], strides = [1, 1]} : vector<8x32xbf16> to vector<8x8xbf16>
    "tpu.trace_start"() <{level = 10 : i32, message = "qd,kd->qk"}> : () -> ()
    %cst_12 = arith.constant dense<0.000000e+00> : vector<8x8xf32>
    %16 = tpu.matmul %13, %14, %cst_12 {dimension_numbers = #tpu.dot_dimension_numbers<[1], [1], [0], [0], [0, 0, 1, 0], [], []>} : vector<8x8xbf16>, vector<8x8xbf16>, vector<8x8xf32> -> vector<8x8xf32>
    "tpu.trace_stop"() : () -> ()
    %cst_13 = arith.constant dense<0xFF800000> : vector<8xf32>
    %17 = vector.multi_reduction <maximumf>, %16, %cst_13 [1] : vector<8x8xf32> to vector<8xf32>
    %18 = vector.shape_cast %17 : vector<8xf32> to vector<8x1xf32>
    %19 = vector.broadcast %18 : vector<8x1xf32> to vector<8x8xf32>
    %20 = arith.subf %16, %19 : vector<8x8xf32>
    %21 = math.exp %20 : vector<8x8xf32>
    %cst_14 = arith.constant dense<0.000000e+00> : vector<8xf32>
    %22 = vector.multi_reduction <add>, %21, %cst_14 [1] : vector<8x8xf32> to vector<8xf32>
    %23 = vector.shape_cast %22 : vector<8xf32> to vector<8x1xf32>
    %24 = tpu.reciprocal %23 {approx = true} : vector<8x1xf32> -> vector<8x1xf32>
    %25 = vector.broadcast %24 : vector<8x1xf32> to vector<8x8xf32>
    %26 = arith.mulf %21, %25 : vector<8x8xf32>
    %27 = arith.truncf %26 : vector<8x8xf32> to vector<8x8xbf16>
    %cst_15 = arith.constant dense<0.000000e+00> : vector<8x8xf32>
    %28 = tpu.matmul %27, %15, %cst_15 {dimension_numbers = #tpu.dot_dimension_numbers<[1], [0], [0], [1], [0, 0, 1, 1], [], []>} : vector<8x8xbf16>, vector<8x8xbf16>, vector<8x8xf32> -> vector<8x8xf32>
    %29 = arith.truncf %28 : vector<8x8xf32> to vector<8x8xbf16>
    %c0_16 = arith.constant 0 : index
    %c0_17 = arith.constant 0 : index
    %30 = vector.load %arg18[%c0_16, %c0_17] : memref<8x32xbf16, #tpu.memory_space<vmem>>, vector<8x8xbf16>
    tpu.vector_store %arg18[%c0_16, %c0_17], %29 {strides = array<i32>} : memref<8x32xbf16, #tpu.memory_space<vmem>>, vector<8x8xbf16>,
    %31 = vector.extract_strided_slice %8 {offsets = [0, 8], sizes = [8, 8], strides = [1, 1]} : vector<8x32xbf16> to vector<8x8xbf16>
    %32 = vector.extract_strided_slice %10 {offsets = [0, 8], sizes = [8, 8], strides = [1, 1]} : vector<8x32xbf16> to vector<8x8xbf16>
    %33 = vector.extract_strided_slice %12 {offsets = [0, 8], sizes = [8, 8], strides = [1, 1]} : vector<8x32xbf16> to vector<8x8xbf16>
    "tpu.trace_start"() <{level = 10 : i32, message = "qd,kd->qk"}> : () -> ()
    %cst_18 = arith.constant dense<0.000000e+00> : vector<8x8xf32>
    %34 = tpu.matmul %31, %32, %cst_18 {dimension_numbers = #tpu.dot_dimension_numbers<[1], [1], [0], [0], [0, 0, 1, 0], [], []>} : vector<8x8xbf16>, vector<8x8xbf16>, vector<8x8xf32> -> vector<8x8xf32>
    "tpu.trace_stop"() : () -> ()
    %cst_19 = arith.constant dense<0xFF800000> : vector<8xf32>
    %35 = vector.multi_reduction <maximumf>, %34, %cst_19 [1] : vector<8x8xf32> to vector<8xf32>
    %36 = vector.shape_cast %35 : vector<8xf32> to vector<8x1xf32>
    %37 = vector.broadcast %36 : vector<8x1xf32> to vector<8x8xf32>
    %38 = arith.subf %34, %37 : vector<8x8xf32>
    %39 = math.exp %38 : vector<8x8xf32>
    %cst_20 = arith.constant dense<0.000000e+00> : vector<8xf32>
    %40 = vector.multi_reduction <add>, %39, %cst_20 [1] : vector<8x8xf32> to vector<8xf32>
    %41 = vector.shape_cast %40 : vector<8xf32> to vector<8x1xf32>
    %42 = tpu.reciprocal %41 {approx = true} : vector<8x1xf32> -> vector<8x1xf32>
    %43 = vector.broadcast %42 : vector<8x1xf32> to vector<8x8xf32>
    %44 = arith.mulf %39, %43 : vector<8x8xf32>
    %45 = arith.truncf %44 : vector<8x8xf32> to vector<8x8xbf16>
    %cst_21 = arith.constant dense<0.000000e+00> : vector<8x8xf32>
    %46 = tpu.matmul %45, %33, %cst_21 {dimension_numbers = #tpu.dot_dimension_numbers<[1], [0], [0], [1], [0, 0, 1, 1], [], []>} : vector<8x8xbf16>, vector<8x8xbf16>, vector<8x8xf32> -> vector<8x8xf32>
    %47 = arith.truncf %46 : vector<8x8xf32> to vector<8x8xbf16>
    %c0_22 = arith.constant 0 : index
    %c8 = arith.constant 8 : index
    %48 = vector.load %arg18[%c0_22, %c8] : memref<8x32xbf16, #tpu.memory_space<vmem>>, vector<8x8xbf16>
    tpu.vector_store %arg18[%c0_22, %c8], %47 {strides = array<i32>} : memref<8x32xbf16, #tpu.memory_space<vmem>>, vector<8x8xbf16>,
    %49 = vector.extract_strided_slice %8 {offsets = [0, 16], sizes = [8, 8], strides = [1, 1]} : vector<8x32xbf16> to vector<8x8xbf16>
    %50 = vector.extract_strided_slice %10 {offsets = [0, 16], sizes = [8, 8], strides = [1, 1]} : vector<8x32xbf16> to vector<8x8xbf16>
    %51 = vector.extract_strided_slice %12 {offsets = [0, 16], sizes = [8, 8], strides = [1, 1]} : vector<8x32xbf16> to vector<8x8xbf16>
    "tpu.trace_start"() <{level = 10 : i32, message = "qd,kd->qk"}> : () -> ()
    %cst_23 = arith.constant dense<0.000000e+00> : vector<8x8xf32>
    %52 = tpu.matmul %49, %50, %cst_23 {dimension_numbers = #tpu.dot_dimension_numbers<[1], [1], [0], [0], [0, 0, 1, 0], [], []>} : vector<8x8xbf16>, vector<8x8xbf16>, vector<8x8xf32> -> vector<8x8xf32>
    "tpu.trace_stop"() : () -> ()
    %cst_24 = arith.constant dense<0xFF800000> : vector<8xf32>
    %53 = vector.multi_reduction <maximumf>, %52, %cst_24 [1] : vector<8x8xf32> to vector<8xf32>
    %54 = vector.shape_cast %53 : vector<8xf32> to vector<8x1xf32>
    %55 = vector.broadcast %54 : vector<8x1xf32> to vector<8x8xf32>
    %56 = arith.subf %52, %55 : vector<8x8xf32>
    %57 = math.exp %56 : vector<8x8xf32>
    %cst_25 = arith.constant dense<0.000000e+00> : vector<8xf32>
    %58 = vector.multi_reduction <add>, %57, %cst_25 [1] : vector<8x8xf32> to vector<8xf32>
    %59 = vector.shape_cast %58 : vector<8xf32> to vector<8x1xf32>
    %60 = tpu.reciprocal %59 {approx = true} : vector<8x1xf32> -> vector<8x1xf32>
    %61 = vector.broadcast %60 : vector<8x1xf32> to vector<8x8xf32>
    %62 = arith.mulf %57, %61 : vector<8x8xf32>
    %63 = arith.truncf %62 : vector<8x8xf32> to vector<8x8xbf16>
    %cst_26 = arith.constant dense<0.000000e+00> : vector<8x8xf32>
    %64 = tpu.matmul %63, %51, %cst_26 {dimension_numbers = #tpu.dot_dimension_numbers<[1], [0], [0], [1], [0, 0, 1, 1], [], []>} : vector<8x8xbf16>, vector<8x8xbf16>, vector<8x8xf32> -> vector<8x8xf32>
    %65 = arith.truncf %64 : vector<8x8xf32> to vector<8x8xbf16>
    %c0_27 = arith.constant 0 : index
    %c16 = arith.constant 16 : index
    %66 = vector.load %arg18[%c0_27, %c16] : memref<8x32xbf16, #tpu.memory_space<vmem>>, vector<8x8xbf16>
    tpu.vector_store %arg18[%c0_27, %c16], %65 {strides = array<i32>} : memref<8x32xbf16, #tpu.memory_space<vmem>>, vector<8x8xbf16>,
    %67 = vector.extract_strided_slice %8 {offsets = [0, 24], sizes = [8, 8], strides = [1, 1]} : vector<8x32xbf16> to vector<8x8xbf16>
    %68 = vector.extract_strided_slice %10 {offsets = [0, 24], sizes = [8, 8], strides = [1, 1]} : vector<8x32xbf16> to vector<8x8xbf16>
    %69 = vector.extract_strided_slice %12 {offsets = [0, 24], sizes = [8, 8], strides = [1, 1]} : vector<8x32xbf16> to vector<8x8xbf16>
    "tpu.trace_start"() <{level = 10 : i32, message = "qd,kd->qk"}> : () -> ()
    %cst_28 = arith.constant dense<0.000000e+00> : vector<8x8xf32>
    %70 = tpu.matmul %67, %68, %cst_28 {dimension_numbers = #tpu.dot_dimension_numbers<[1], [1], [0], [0], [0, 0, 1, 0], [], []>} : vector<8x8xbf16>, vector<8x8xbf16>, vector<8x8xf32> -> vector<8x8xf32>
    "tpu.trace_stop"() : () -> ()
    %cst_29 = arith.constant dense<0xFF800000> : vector<8xf32>
    %71 = vector.multi_reduction <maximumf>, %70, %cst_29 [1] : vector<8x8xf32> to vector<8xf32>
    %72 = vector.shape_cast %71 : vector<8xf32> to vector<8x1xf32>
    %73 = vector.broadcast %72 : vector<8x1xf32> to vector<8x8xf32>
    %74 = arith.subf %70, %73 : vector<8x8xf32>
    %75 = math.exp %74 : vector<8x8xf32>
    %cst_30 = arith.constant dense<0.000000e+00> : vector<8xf32>
    %76 = vector.multi_reduction <add>, %75, %cst_30 [1] : vector<8x8xf32> to vector<8xf32>
    %77 = vector.shape_cast %76 : vector<8xf32> to vector<8x1xf32>
    %78 = tpu.reciprocal %77 {approx = true} : vector<8x1xf32> -> vector<8x1xf32>
    %79 = vector.broadcast %78 : vector<8x1xf32> to vector<8x8xf32>
    %80 = arith.mulf %75, %79 : vector<8x8xf32>
    %81 = arith.truncf %80 : vector<8x8xf32> to vector<8x8xbf16>
    %cst_31 = arith.constant dense<0.000000e+00> : vector<8x8xf32>
    %82 = tpu.matmul %81, %69, %cst_31 {dimension_numbers = #tpu.dot_dimension_numbers<[1], [0], [0], [1], [0, 0, 1, 1], [], []>} : vector<8x8xbf16>, vector<8x8xbf16>, vector<8x8xf32> -> vector<8x8xf32>
    %83 = arith.truncf %82 : vector<8x8xf32> to vector<8x8xbf16>
    %c0_32 = arith.constant 0 : index
    %c24 = arith.constant 24 : index
    %84 = vector.load %arg18[%c0_32, %c24] : memref<8x32xbf16, #tpu.memory_space<vmem>>, vector<8x8xbf16>
    tpu.vector_store %arg18[%c0_32, %c24], %83 {strides = array<i32>} : memref<8x32xbf16, #tpu.memory_space<vmem>>, vector<8x8xbf16>,
    %c0_33 = arith.constant 0 : index
    %c0_34 = arith.constant 0 : index
    %85 = vector.load %arg18[%c0_33, %c0_34] : memref<8x32xbf16, #tpu.memory_space<vmem>>, vector<8x32xbf16>
    %c0_35 = arith.constant 0 : index
    %c0_36 = arith.constant 0 : index
    %86 = vector.load %arg7[%c0_35, %c0_36] : memref<32x32xbf16, #tpu.memory_space<vmem>>, vector<32x32xbf16>
    %cst_37 = arith.constant dense<0.000000e+00> : vector<8x32xf32>
    %87 = tpu.matmul %85, %86, %cst_37 {dimension_numbers = #tpu.dot_dimension_numbers<[1], [0], [0], [1], [0, 0, 1, 1], [], []>} : vector<8x32xbf16>, vector<32x32xbf16>, vector<8x32xf32> -> vector<8x32xf32>
    %c0_38 = arith.constant 0 : index
    %c0_39 = arith.constant 0 : index
    %88 = vector.load %arg8[%c0_38, %c0_39] : memref<1x32xf32, #tpu.memory_space<vmem>>, vector<1x32xf32>
    %89 = vector.broadcast %88 : vector<1x32xf32> to vector<8x32xf32>
    %90 = arith.addf %87, %89 : vector<8x32xf32>
    %91 = arith.addf %1, %90 : vector<8x32xf32>
    %c0_40 = arith.constant 0 : index
    %c0_41 = arith.constant 0 : index
    %92 = vector.load %arg9[%c0_40, %c0_41] : memref<1x32xf32, #tpu.memory_space<vmem>>, vector<1x32xf32>
    %c0_42 = arith.constant 0 : index
    %c0_43 = arith.constant 0 : index
    %93 = vector.load %arg10[%c0_42, %c0_43] : memref<1x32xf32, #tpu.memory_space<vmem>>, vector<1x32xf32>
    %cst_44 = arith.constant dense<0.000000e+00> : vector<8xf32>
    %94 = vector.multi_reduction <add>, %91, %cst_44 [1] : vector<8x32xf32> to vector<8xf32>
    %95 = vector.shape_cast %94 : vector<8xf32> to vector<8x1xf32>
    %cst_45 = arith.constant 3.200000e+01 : f32
    %96 = vector.broadcast %cst_45 : f32 to vector<8x1xf32>
    %97 = arith.divf %95, %96 : vector<8x1xf32>
    %98 = vector.broadcast %97 : vector<8x1xf32> to vector<8x32xf32>
    %99 = arith.subf %91, %98 : vector<8x32xf32>
    %100 = arith.mulf %99, %99 : vector<8x32xf32>
    %cst_46 = arith.constant dense<0.000000e+00> : vector<8xf32>
    %101 = vector.multi_reduction <add>, %100, %cst_46 [1] : vector<8x32xf32> to vector<8xf32>
    %102 = vector.shape_cast %101 : vector<8xf32> to vector<8x1xf32>
    %cst_47 = arith.constant 3.200000e+01 : f32
    %103 = vector.broadcast %cst_47 : f32 to vector<8x1xf32>
    %104 = arith.divf %102, %103 : vector<8x1xf32>
    %105 = vector.broadcast %97 : vector<8x1xf32> to vector<8x32xf32>
    %106 = arith.subf %91, %105 : vector<8x32xf32>
    %cst_48 = arith.constant 9.99999974E-6 : f32
    %107 = vector.broadcast %cst_48 : f32 to vector<8x1xf32>
    %108 = arith.addf %104, %107 : vector<8x1xf32>
    %109 = math.rsqrt %108 : vector<8x1xf32>
    %110 = vector.broadcast %109 : vector<8x1xf32> to vector<8x32xf32>
    %111 = arith.mulf %106, %110 : vector<8x32xf32>
    %112 = vector.broadcast %92 : vector<1x32xf32> to vector<8x32xf32>
    %113 = arith.mulf %111, %112 : vector<8x32xf32>
    %114 = vector.broadcast %93 : vector<1x32xf32> to vector<8x32xf32>
    %115 = arith.addf %113, %114 : vector<8x32xf32>
    %116 = arith.truncf %115 : vector<8x32xf32> to vector<8x32xbf16>
    %cst_49 = arith.constant 0.000000e+00 : f32
    %117 = vector.broadcast %cst_49 : f32 to vector<8x32xf32>
    %c0_50 = arith.constant 0 : index
    %c0_51 = arith.constant 0 : index
    %118 = vector.load %arg11[%c0_50, %c0_51] : memref<32x128xbf16, #tpu.memory_space<vmem>>, vector<32x128xbf16>
    %cst_52 = arith.constant dense<0.000000e+00> : vector<8x128xf32>
    %119 = tpu.matmul %116, %118, %cst_52 {dimension_numbers = #tpu.dot_dimension_numbers<[1], [0], [0], [1], [0, 0, 1, 1], [], []>} : vector<8x32xbf16>, vector<32x128xbf16>, vector<8x128xf32> -> vector<8x128xf32>
    %c0_53 = arith.constant 0 : index
    %c0_54 = arith.constant 0 : index
    %120 = vector.load %arg12[%c0_53, %c0_54] : memref<1x128xf32, #tpu.memory_space<vmem>>, vector<1x128xf32>
    %121 = vector.broadcast %120 : vector<1x128xf32> to vector<8x128xf32>
    %122 = arith.addf %119, %121 : vector<8x128xf32>
    %cst_55 = arith.constant 0.000000e+00 : f32
    %123 = vector.broadcast %cst_55 : f32 to vector<8x128xf32>
    %124 = arith.maximumf %122, %123 : vector<8x128xf32>
    %125 = arith.truncf %124 : vector<8x128xf32> to vector<8x128xbf16>
    %c0_56 = arith.constant 0 : index
    %c0_57 = arith.constant 0 : index
    %126 = vector.load %arg13[%c0_56, %c0_57] : memref<128x32xbf16, #tpu.memory_space<vmem>>, vector<128x32xbf16>
    %cst_58 = arith.constant dense<0.000000e+00> : vector<8x32xf32>
    %127 = tpu.matmul %125, %126, %cst_58 {dimension_numbers = #tpu.dot_dimension_numbers<[1], [0], [0], [1], [0, 0, 1, 1], [], []>} : vector<8x128xbf16>, vector<128x32xbf16>, vector<8x32xf32> -> vector<8x32xf32>
    %128 = arith.addf %117, %127 : vector<8x32xf32>
    %c0_59 = arith.constant 0 : index
    %c0_60 = arith.constant 0 : index
    %129 = vector.load %arg14[%c0_59, %c0_60] : memref<1x32xf32, #tpu.memory_space<vmem>>, vector<1x32xf32>
    %130 = vector.broadcast %129 : vector<1x32xf32> to vector<8x32xf32>
    %131 = arith.addf %128, %130 : vector<8x32xf32>
    %132 = arith.addf %115, %131 : vector<8x32xf32>
    %c0_61 = arith.constant 0 : index
    %c0_62 = arith.constant 0 : index
    %133 = vector.load %arg15[%c0_61, %c0_62] : memref<1x32xf32, #tpu.memory_space<vmem>>, vector<1x32xf32>
    %c0_63 = arith.constant 0 : index
    %c0_64 = arith.constant 0 : index
    %134 = vector.load %arg16[%c0_63, %c0_64] : memref<1x32xf32, #tpu.memory_space<vmem>>, vector<1x32xf32>
    %cst_65 = arith.constant dense<0.000000e+00> : vector<8xf32>
    %135 = vector.multi_reduction <add>, %132, %cst_65 [1] : vector<8x32xf32> to vector<8xf32>
    %136 = vector.shape_cast %135 : vector<8xf32> to vector<8x1xf32>
    %cst_66 = arith.constant 3.200000e+01 : f32
    %137 = vector.broadcast %cst_66 : f32 to vector<8x1xf32>
    %138 = arith.divf %136, %137 : vector<8x1xf32>
    %139 = vector.broadcast %138 : vector<8x1xf32> to vector<8x32xf32>
    %140 = arith.subf %132, %139 : vector<8x32xf32>
    %141 = arith.mulf %140, %140 : vector<8x32xf32>
    %cst_67 = arith.constant dense<0.000000e+00> : vector<8xf32>
    %142 = vector.multi_reduction <add>, %141, %cst_67 [1] : vector<8x32xf32> to vector<8xf32>
    %143 = vector.shape_cast %142 : vector<8xf32> to vector<8x1xf32>
    %cst_68 = arith.constant 3.200000e+01 : f32
    %144 = vector.broadcast %cst_68 : f32 to vector<8x1xf32>
    %145 = arith.divf %143, %144 : vector<8x1xf32>
    %146 = vector.broadcast %138 : vector<8x1xf32> to vector<8x32xf32>
    %147 = arith.subf %132, %146 : vector<8x32xf32>
    %cst_69 = arith.constant 9.99999974E-6 : f32
    %148 = vector.broadcast %cst_69 : f32 to vector<8x1xf32>
    %149 = arith.addf %145, %148 : vector<8x1xf32>
    %150 = math.rsqrt %149 : vector<8x1xf32>
    %151 = vector.broadcast %150 : vector<8x1xf32> to vector<8x32xf32>
    %152 = arith.mulf %147, %151 : vector<8x32xf32>
    %153 = vector.broadcast %133 : vector<1x32xf32> to vector<8x32xf32>
    %154 = arith.mulf %152, %153 : vector<8x32xf32>
    %155 = vector.broadcast %134 : vector<1x32xf32> to vector<8x32xf32>
    %156 = arith.addf %154, %155 : vector<8x32xf32>
    %c0_70 = arith.constant 0 : index
    %c0_71 = arith.constant 0 : index
    %c0_72 = arith.constant 0 : index
    %157 = vector.load %arg17[%c0_70, %c0_71, %c0_72] : memref<1x8x32xf32, #tpu.memory_space<vmem>>, vector<1x8x32xf32>
    %158 = vector.shape_cast %157 : vector<1x8x32xf32> to vector<8x32xf32>
    %159 = vector.shape_cast %156 : vector<8x32xf32> to vector<1x8x32xf32>
    tpu.vector_store %arg17[%c0_70, %c0_71, %c0_72], %159 {strides = array<i32>} : memref<1x8x32xf32, #tpu.memory_space<vmem>>, vector<1x8x32xf32>,
    return
  }
  func.func @transform_0(%arg0: i32, %arg1: i32) -> (i32, i32, i32) {
    %c0_i32 = arith.constant 0 : i32
    %c0_i32_0 = arith.constant 0 : i32
    return %arg0, %arg1, %c0_i32 : i32, i32, i32
  }
  func.func @transform_1(%arg0: i32, %arg1: i32) -> (i32, i32, i32) {
    %c0_i32 = arith.constant 0 : i32
    %c0_i32_0 = arith.constant 0 : i32
    %c0_i32_1 = arith.constant 0 : i32
    return %arg0, %c0_i32, %c0_i32_0 : i32, i32, i32
  }
  func.func @transform_2(%arg0: i32, %arg1: i32) -> (i32, i32, i32) {
    %c0_i32 = arith.constant 0 : i32
    %c0_i32_0 = arith.constant 0 : i32
    %c0_i32_1 = arith.constant 0 : i32
    return %arg0, %c0_i32, %c0_i32_0 : i32, i32, i32
  }
  func.func @transform_3(%arg0: i32, %arg1: i32) -> (i32, i32) {
    %c0_i32 = arith.constant 0 : i32
    %c0_i32_0 = arith.constant 0 : i32
    %c0_i32_1 = arith.constant 0 : i32
    return %c0_i32, %c0_i32_0 : i32, i32
  }
  func.func @transform_4(%arg0: i32, %arg1: i32) -> (i32, i32) {
    %c0_i32 = arith.constant 0 : i32
    %c0_i32_0 = arith.constant 0 : i32
    %c0_i32_1 = arith.constant 0 : i32
    return %c0_i32, %c0_i32_0 : i32, i32
  }
  func.func @transform_5(%arg0: i32, %arg1: i32) -> (i32, i32) {
    %c0_i32 = arith.constant 0 : i32
    %c0_i32_0 = arith.constant 0 : i32
    %c0_i32_1 = arith.constant 0 : i32
    return %c0_i32, %c0_i32_0 : i32, i32
  }
  func.func @transform_6(%arg0: i32, %arg1: i32) -> (i32, i32) {
    %c0_i32 = arith.constant 0 : i32
    %c0_i32_0 = arith.constant 0 : i32
    %c0_i32_1 = arith.constant 0 : i32
    return %c0_i32, %c0_i32_0 : i32, i32
  }
  func.func @transform_7(%arg0: i32, %arg1: i32) -> (i32, i32) {
    %c0_i32 = arith.constant 0 : i32
    %c0_i32_0 = arith.constant 0 : i32
    %c0_i32_1 = arith.constant 0 : i32
    return %c0_i32, %c0_i32_0 : i32, i32
  }
  func.func @transform_8(%arg0: i32, %arg1: i32) -> (i32, i32) {
    %c0_i32 = arith.constant 0 : i32
    %c0_i32_0 = arith.constant 0 : i32
    %c0_i32_1 = arith.constant 0 : i32
    return %c0_i32, %c0_i32_0 : i32, i32
  }
  func.func @transform_9(%arg0: i32, %arg1: i32) -> (i32, i32) {
    %c0_i32 = arith.constant 0 : i32
    %c0_i32_0 = arith.constant 0 : i32
    %c0_i32_1 = arith.constant 0 : i32
    return %c0_i32, %c0_i32_0 : i32, i32
  }
  func.func @transform_10(%arg0: i32, %arg1: i32) -> (i32, i32) {
    %c0_i32 = arith.constant 0 : i32
    %c0_i32_0 = arith.constant 0 : i32
    %c0_i32_1 = arith.constant 0 : i32
    return %c0_i32, %c0_i32_0 : i32, i32
  }
  func.func @transform_11(%arg0: i32, %arg1: i32) -> (i32, i32) {
    %c0_i32 = arith.constant 0 : i32
    %c0_i32_0 = arith.constant 0 : i32
    %c0_i32_1 = arith.constant 0 : i32
    return %c0_i32, %c0_i32_0 : i32, i32
  }
  func.func @transform_12(%arg0: i32, %arg1: i32) -> (i32, i32) {
    %c0_i32 = arith.constant 0 : i32
    %c0_i32_0 = arith.constant 0 : i32
    %c0_i32_1 = arith.constant 0 : i32
    return %c0_i32, %c0_i32_0 : i32, i32
  }
  func.func @transform_13(%arg0: i32, %arg1: i32) -> (i32, i32) {
    %c0_i32 = arith.constant 0 : i32
    %c0_i32_0 = arith.constant 0 : i32
    %c0_i32_1 = arith.constant 0 : i32
    return %c0_i32, %c0_i32_0 : i32, i32
  }
  func.func @transform_14(%arg0: i32, %arg1: i32) -> (i32, i32) {
    %c0_i32 = arith.constant 0 : i32
    %c0_i32_0 = arith.constant 0 : i32
    %c0_i32_1 = arith.constant 0 : i32
    return %c0_i32, %c0_i32_0 : i32, i32
  }
  func.func @transform_15(%arg0: i32, %arg1: i32) -> (i32, i32, i32) {
    %c0_i32 = arith.constant 0 : i32
    %c0_i32_0 = arith.constant 0 : i32
    return %arg0, %arg1, %c0_i32 : i32, i32, i32
  }
}

module attributes {stable_mosaic.version = 11 : i64} {
  func.func @_xmt_block_kernel(%arg0: i32, %arg1: i32, %arg2: memref<1x8x32xf32, #tpu.memory_space<vmem>>, %arg3: memref<1x8x32xbf16, #tpu.memory_space<vmem>>, %arg4: memref<1x8x32xbf16, #tpu.memory_space<vmem>>, %arg5: memref<32x32xbf16, #tpu.memory_space<vmem>>, %arg6: memref<1x32xf32, #tpu.memory_space<vmem>>, %arg7: memref<32x32xbf16, #tpu.memory_space<vmem>>, %arg8: memref<1x32xf32, #tpu.memory_space<vmem>>, %arg9: memref<1x32xf32, #tpu.memory_space<vmem>>, %arg10: memref<1x32xf32, #tpu.memory_space<vmem>>, %arg11: memref<32x128xbf16, #tpu.memory_space<vmem>>, %arg12: memref<1x128xf32, #tpu.memory_space<vmem>>, %arg13: memref<128x32xbf16, #tpu.memory_space<vmem>>, %arg14: memref<1x32xf32, #tpu.memory_space<vmem>>, %arg15: memref<1x32xf32, #tpu.memory_space<vmem>>, %arg16: memref<1x32xf32, #tpu.memory_space<vmem>>, %arg17: memref<1x8x32xf32, #tpu.memory_space<vmem>>, %arg18: memref<8x32xbf16, #tpu.memory_space<vmem>>) attributes {dimension_semantics = [#tpu.dimension_semantics<parallel>, #tpu.dimension_semantics<parallel>], iteration_bounds = array<i64: 2, 1>, scalar_prefetch = 0 : i64, scratch_operands = 1 : i64, tpu.core_type = #tpu.core_type<tc>, window_params = [{transform_indices = @transform_0, window_bounds = array<i64: 1, 8, 32>}, {transform_indices = @transform_1, window_bounds = array<i64: 1, 8, 32>}, {transform_indices = @transform_2, window_bounds = array<i64: 1, 8, 32>}, {pipeline_mode = #tpu.pipeline_mode<synchronous>, transform_indices = @transform_3, window_bounds = array<i64: 32, 32>}, {pipeline_mode = #tpu.pipeline_mode<synchronous>, transform_indices = @transform_4, window_bounds = array<i64: 1, 32>}, {pipeline_mode = #tpu.pipeline_mode<synchronous>, transform_indices = @transform_5, window_bounds = array<i64: 32, 32>}, {pipeline_mode = #tpu.pipeline_mode<synchronous>, transform_indices = @transform_6, window_bounds = array<i64: 1, 32>}, {pipeline_mode = #tpu.pipeline_mode<synchronous>, transform_indices = @transform_7, window_bounds = array<i64: 1, 32>}, {pipeline_mode = #tpu.pipeline_mode<synchronous>, transform_indices = @transform_8, window_bounds = array<i64: 1, 32>}, {pipeline_mode = #tpu.pipeline_mode<synchronous>, transform_indices = @transform_9, window_bounds = array<i64: 32, 128>}, {pipeline_mode = #tpu.pipeline_mode<synchronous>, transform_indices = @transform_10, window_bounds = array<i64: 1, 128>}, {pipeline_mode = #tpu.pipeline_mode<synchronous>, transform_indices = @transform_11, window_bounds = array<i64: 128, 32>}, {pipeline_mode = #tpu.pipeline_mode<synchronous>, transform_indices = @transform_12, window_bounds = array<i64: 1, 32>}, {pipeline_mode = #tpu.pipeline_mode<synchronous>, transform_indices = @transform_13, window_bounds = array<i64: 1, 32>}, {pipeline_mode = #tpu.pipeline_mode<synchronous>, transform_indices = @transform_14, window_bounds = array<i64: 1, 32>}, {transform_indices = @transform_15, window_bounds = array<i64: 1, 8, 32>}]} {
    %c0 = arith.constant 0 : index
    %c0_0 = arith.constant 0 : index
    %c0_1 = arith.constant 0 : index
    %0 = vector.load %arg2[%c0, %c0_0, %c0_1] : memref<1x8x32xf32, #tpu.memory_space<vmem>>, vector<1x8x32xf32>
    %1 = vector.shape_cast %0 : vector<1x8x32xf32> to vector<8x32xf32>
    %2 = arith.truncf %1 : vector<8x32xf32> to vector<8x32xbf16>
    %c0_2 = arith.constant 0 : index
    %c0_3 = arith.constant 0 : index
    %3 = vector.load %arg5[%c0_2, %c0_3] : memref<32x32xbf16, #tpu.memory_space<vmem>>, vector<32x32xbf16>
    %cst = arith.constant dense<0.000000e+00> : vector<8x32xf32>
    %4 = tpu.matmul %2, %3, %cst {dimension_numbers = #tpu.dot_dimension_numbers<[1], [0], [0], [1], [0, 0, 1, 1], [], []>} : vector<8x32xbf16>, vector<32x32xbf16>, vector<8x32xf32> -> vector<8x32xf32>
    %c0_4 = arith.constant 0 : index
    %c0_5 = arith.constant 0 : index
    %5 = vector.load %arg6[%c0_4, %c0_5] : memref<1x32xf32, #tpu.memory_space<vmem>>, vector<1x32xf32>
    %6 = vector.broadcast %5 : vector<1x32xf32> to vector<8x32xf32>
    %7 = arith.addf %4, %6 : vector<8x32xf32>
    %8 = arith.truncf %7 : vector<8x32xf32> to vector<8x32xbf16>
    %c0_6 = arith.constant 0 : index
    %c0_7 = arith.constant 0 : index
    %c0_8 = arith.constant 0 : index
    %9 = vector.load %arg3[%c0_6, %c0_7, %c0_8] : memref<1x8x32xbf16, #tpu.memory_space<vmem>>, vector<1x8x32xbf16>
    %10 = vector.shape_cast %9 : vector<1x8x32xbf16> to vector<8x32xbf16>
    %c0_9 = arith.constant 0 : index
    %c0_10 = arith.constant 0 : index
    %c0_11 = arith.constant 0 : index
    %11 = vector.load %arg4[%c0_9, %c0_10, %c0_11] : memref<1x8x32xbf16, #tpu.memory_space<vmem>>, vector<1x8x32xbf16>
    %12 = vector.shape_cast %11 : vector<1x8x32xbf16> to vector<8x32xbf16>
    %13 = vector.extract_strided_slice %8 {offsets = [0, 0], sizes = [8, 8], strides = [1, 1]} : vector<8x32xbf16> to vector<8x8xbf16>
    %14 = vector.extract_strided_slice %10 {offsets = [0, 0], sizes = [8, 8], strides = [1, 1]} : vector<8x32xbf16> to vector<8x8xbf16>
    %15 = vector.extract_strided_slice %12 {offsets = [0, 0], sizes = [8, 8], strides = [1, 1]} : vector<8x32xbf16> to vector<8x8xbf16>
    "tpu.trace_start"() <{level = 10 : i32, message = "qd,kd->qk"}> : () -> ()
    %cst_12 = arith.constant dense<0.000000e+00> : vector<8x8xf32>
    %16 = tpu.matmul %13, %14, %cst_12 {dimension_numbers = #tpu.dot_dimension_numbers<[1], [1], [0], [0], [0, 0, 1, 0], [], []>} : vector<8x8xbf16>, vector<8x8xbf16>, vector<8x8xf32> -> vector<8x8xf32>
    "tpu.trace_stop"() : () -> ()
    %cst_13 = arith.constant dense<0xFF800000> : vector<8xf32>
    %17 = vector.multi_reduction <maximumf>, %16, %cst_13 [1] : vector<8x8xf32> to vector<8xf32>
    %18 = vector.shape_cast %17 : vector<8xf32> to vector<8x1xf32>
    %19 = vector.broadcast %18 : vector<8x1xf32> to vector<8x8xf32>
    %20 = arith.subf %16, %19 : vector<8x8xf32>
    %21 = math.exp %20 : vector<8x8xf32>
    %cst_14 = arith.constant dense<0.000000e+00> : vector<8xf32>
    %22 = vector.multi_reduction <add>, %21, %cst_14 [1] : vector<8x8xf32> to vector<8xf32>
    %23 = vector.shape_cast %22 : vector<8xf32> to vector<8x1xf32>
    %24 = tpu.reciprocal %23 {approx = true} : vector<8x1xf32> -> vector<8x1xf32>
    %25 = vector.broadcast %24 : vector<8x1xf32> to vector<8x8xf32>
    %26 = arith.mulf %21, %25 : vector<8x8xf32>
    %27 = arith.truncf %26 : vector<8x8xf32> to vector<8x8xbf16>
    %cst_15 = arith.constant dense<0.000000e+00> : vector<8x8xf32>
    %28 = tpu.matmul %27, %15, %cst_15 {dimension_numbers = #tpu.dot_dimension_numbers<[1], [0], [0], [1], [0, 0, 1, 1], [], []>} : vector<8x8xbf16>, vector<8x8xbf16>, vector<8x8xf32> -> vector<8x8xf32>
    %29 = arith.truncf %28 : vector<8x8xf32> to vector<8x8xbf16>
    %c0_16 = arith.constant 0 : index
    %c0_17 = arith.constant 0 : index
    %30 = vector.load %arg18[%c0_16, %c0_17] : memref<8x32xbf16, #tpu.memory_space<vmem>>, vector<8x8xbf16>
    tpu.vector_store %arg18[%c0_16, %c0_17], %29 {strides = array<i32>} : memref<8x32xbf16, #tpu.memory_space<vmem>>, vector<8x8xbf16>,
    %31 = vector.extract_strided_slice %8 {offsets = [0, 8], sizes = [8, 8], strides = [1, 1]} : vector<8x32xbf16> to vector<8x8xbf16>
    %32 = vector.extract_strided_slice %10 {offsets = [0, 8], sizes = [8, 8], strides = [1, 1]} : vector<8x32xbf16> to vector<8x8xbf16>
    %33 = vector.extract_strided_slice %12 {offsets = [0, 8], sizes = [8, 8], strides = [1, 1]} : vector<8x32xbf16> to vector<8x8xbf16>
    "tpu.trace_start"() <{level = 10 : i32, message = "qd,kd->qk"}> : () -> ()
    %cst_18 = arith.constant dense<0.000000e+00> : vector<8x8xf32>
    %34 = tpu.matmul %31, %32, %cst_18 {dimension_numbers = #tpu.dot_dimension_numbers<[1], [1], [0], [0], [0, 0, 1, 0], [], []>} : vector<8x8xbf16>, vector<8x8xbf16>, vector<8x8xf32> -> vector<8x8xf32>
    "tpu.trace_stop"() : () -> ()
    %cst_19 = arith.constant dense<0xFF800000> : vector<8xf32>
    %35 = vector.multi_reduction <maximumf>, %34, %cst_19 [1] : vector<8x8xf32> to vector<8xf32>
    %36 = vector.shape_cast %35 : vector<8xf32> to vector<8x1xf32>
    %37 = vector.broadcast %36 : vector<8x1xf32> to vector<8x8xf32>
    %38 = arith.subf %34, %37 : vector<8x8xf32>
    %39 = math.exp %38 : vector<8x8xf32>
    %cst_20 = arith.constant dense<0.000000e+00> : vector<8xf32>
    %40 = vector.multi_reduction <add>, %39, %cst_20 [1] : vector<8x8xf32> to vector<8xf32>
    %41 = vector.shape_cast %40 : vector<8xf32> to vector<8x1xf32>
    %42 = tpu.reciprocal %41 {approx = true} : vector<8x1xf32> -> vector<8x1xf32>
    %43 = vector.broadcast %42 : vector<8x1xf32> to vector<8x8xf32>
    %44 = arith.mulf %39, %43 : vector<8x8xf32>
    %45 = arith.truncf %44 : vector<8x8xf32> to vector<8x8xbf16>
    %cst_21 = arith.constant dense<0.000000e+00> : vector<8x8xf32>
    %46 = tpu.matmul %45, %33, %cst_21 {dimension_numbers = #tpu.dot_dimension_numbers<[1], [0], [0], [1], [0, 0, 1, 1], [], []>} : vector<8x8xbf16>, vector<8x8xbf16>, vector<8x8xf32> -> vector<8x8xf32>
    %47 = arith.truncf %46 : vector<8x8xf32> to vector<8x8xbf16>
    %c0_22 = arith.constant 0 : index
    %c8 = arith.constant 8 : index
    %48 = vector.load %arg18[%c0_22, %c8] : memref<8x32xbf16, #tpu.memory_space<vmem>>, vector<8x8xbf16>
    tpu.vector_store %arg18[%c0_22, %c8], %47 {strides = array<i32>} : memref<8x32xbf16, #tpu.memory_space<vmem>>, vector<8x8xbf16>,
    %49 = vector.extract_strided_slice %8 {offsets = [0, 16], sizes = [8, 8], strides = [1, 1]} : vector<8x32xbf16> to vector<8x8xbf16>
    %50 = vector.extract_strided_slice %10 {offsets = [0, 16], sizes = [8, 8], strides = [1, 1]} : vector<8x32xbf16> to vector<8x8xbf16>
    %51 = vector.extract_strided_slice %12 {offsets = [0, 16], sizes = [8, 8], strides = [1, 1]} : vector<8x32xbf16> to vector<8x8xbf16>
    "tpu.trace_start"() <{level = 10 : i32, message = "qd,kd->qk"}> : () -> ()
    %cst_23 = arith.constant dense<0.000000e+00> : vector<8x8xf32>
    %52 = tpu.matmul %49, %50, %cst_23 {dimension_numbers = #tpu.dot_dimension_numbers<[1], [1], [0], [0], [0, 0, 1, 0], [], []>} : vector<8x8xbf16>, vector<8x8xbf16>, vector<8x8xf32> -> vector<8x8xf32>
    "tpu.trace_stop"() : () -> ()
    %cst_24 = arith.constant dense<0xFF800000> : vector<8xf32>
    %53 = vector.multi_reduction <maximumf>, %52, %cst_24 [1] : vector<8x8xf32> to vector<8xf32>
    %54 = vector.shape_cast %53 : vector<8xf32> to vector<8x1xf32>
    %55 = vector.broadcast %54 : vector<8x1xf32> to vector<8x8xf32>
    %56 = arith.subf %52, %55 : vector<8x8xf32>
    %57 = math.exp %56 : vector<8x8xf32>
    %cst_25 = arith.constant dense<0.000000e+00> : vector<8xf32>
    %58 = vector.multi_reduction <add>, %57, %cst_25 [1] : vector<8x8xf32> to vector<8xf32>
    %59 = vector.shape_cast %58 : vector<8xf32> to vector<8x1xf32>
    %60 = tpu.reciprocal %59 {approx = true} : vector<8x1xf32> -> vector<8x1xf32>
    %61 = vector.broadcast %60 : vector<8x1xf32> to vector<8x8xf32>
    %62 = arith.mulf %57, %61 : vector<8x8xf32>
    %63 = arith.truncf %62 : vector<8x8xf32> to vector<8x8xbf16>
    %cst_26 = arith.constant dense<0.000000e+00> : vector<8x8xf32>
    %64 = tpu.matmul %63, %51, %cst_26 {dimension_numbers = #tpu.dot_dimension_numbers<[1], [0], [0], [1], [0, 0, 1, 1], [], []>} : vector<8x8xbf16>, vector<8x8xbf16>, vector<8x8xf32> -> vector<8x8xf32>
    %65 = arith.truncf %64 : vector<8x8xf32> to vector<8x8xbf16>
    %c0_27 = arith.constant 0 : index
    %c16 = arith.constant 16 : index
    %66 = vector.load %arg18[%c0_27, %c16] : memref<8x32xbf16, #tpu.memory_space<vmem>>, vector<8x8xbf16>
    tpu.vector_store %arg18[%c0_27, %c16], %65 {strides = array<i32>} : memref<8x32xbf16, #tpu.memory_space<vmem>>, vector<8x8xbf16>,
    %67 = vector.extract_strided_slice %8 {offsets = [0, 24], sizes = [8, 8], strides = [1, 1]} : vector<8x32xbf16> to vector<8x8xbf16>
    %68 = vector.extract_strided_slice %10 {offsets = [0, 24], sizes = [8, 8], strides = [1, 1]} : vector<8x32xbf16> to vector<8x8xbf16>
    %69 = vector.extract_strided_slice %12 {offsets = [0, 24], sizes = [8, 8], strides = [1, 1]} : vector<8x32xbf16> to vector<8x8xbf16>
    "tpu.trace_start"() <{level = 10 : i32, message = "qd,kd->qk"}> : () -> ()
    %cst_28 = arith.constant dense<0.000000e+00> : vector<8x8xf32>
    %70 = tpu.matmul %67, %68, %cst_28 {dimension_numbers = #tpu.dot_dimension_numbers<[1], [1], [0], [0], [0, 0, 1, 0], [], []>} : vector<8x8xbf16>, vector<8x8xbf16>, vector<8x8xf32> -> vector<8x8xf32>
    "tpu.trace_stop"() : () -> ()
    %cst_29 = arith.constant dense<0xFF800000> : vector<8xf32>
    %71 = vector.multi_reduction <maximumf>, %70, %cst_29 [1] : vector<8x8xf32> to vector<8xf32>
    %72 = vector.shape_cast %71 : vector<8xf32> to vector<8x1xf32>
    %73 = vector.broadcast %72 : vector<8x1xf32> to vector<8x8xf32>
    %74 = arith.subf %70, %73 : vector<8x8xf32>
    %75 = math.exp %74 : vector<8x8xf32>
    %cst_30 = arith.constant dense<0.000000e+00> : vector<8xf32>
    %76 = vector.multi_reduction <add>, %75, %cst_30 [1] : vector<8x8xf32> to vector<8xf32>
    %77 = vector.shape_cast %76 : vector<8xf32> to vector<8x1xf32>
    %78 = tpu.reciprocal %77 {approx = true} : vector<8x1xf32> -> vector<8x1xf32>
    %79 = vector.broadcast %78 : vector<8x1xf32> to vector<8x8xf32>
    %80 = arith.mulf %75, %79 : vector<8x8xf32>
    %81 = arith.truncf %80 : vector<8x8xf32> to vector<8x8xbf16>
    %cst_31 = arith.constant dense<0.000000e+00> : vector<8x8xf32>
    %82 = tpu.matmul %81, %69, %cst_31 {dimension_numbers = #tpu.dot_dimension_numbers<[1], [0], [0], [1], [0, 0, 1, 1], [], []>} : vector<8x8xbf16>, vector<8x8xbf16>, vector<8x8xf32> -> vector<8x8xf32>
    %83 = arith.truncf %82 : vector<8x8xf32> to vector<8x8xbf16>
    %c0_32 = arith.constant 0 : index
    %c24 = arith.constant 24 : index
    %84 = vector.load %arg18[%c0_32, %c24] : memref<8x32xbf16, #tpu.memory_space<vmem>>, vector<8x8xbf16>
    tpu.vector_store %arg18[%c0_32, %c24], %83 {strides = array<i32>} : memref<8x32xbf16, #tpu.memory_space<vmem>>, vector<8x8xbf16>,
    %c0_33 = arith.constant 0 : index
    %c0_34 = arith.constant 0 : index
    %85 = vector.load %arg18[%c0_33, %c0_34] : memref<8x32xbf16, #tpu.memory_space<vmem>>, vector<8x32xbf16>
    %c0_35 = arith.constant 0 : index
    %c0_36 = arith.constant 0 : index
    %86 = vector.load %arg7[%c0_35, %c0_36] : memref<32x32xbf16, #tpu.memory_space<vmem>>, vector<32x32xbf16>
    %cst_37 = arith.constant dense<0.000000e+00> : vector<8x32xf32>
    %87 = tpu.matmul %85, %86, %cst_37 {dimension_numbers = #tpu.dot_dimension_numbers<[1], [0], [0], [1], [0, 0, 1, 1], [], []>} : vector<8x32xbf16>, vector<32x32xbf16>, vector<8x32xf32> -> vector<8x32xf32>
    %c0_38 = arith.constant 0 : index
    %c0_39 = arith.constant 0 : index
    %88 = vector.load %arg8[%c0_38, %c0_39] : memref<1x32xf32, #tpu.memory_space<vmem>>, vector<1x32xf32>
    %89 = vector.broadcast %88 : vector<1x32xf32> to vector<8x32xf32>
    %90 = arith.addf %87, %89 : vector<8x32xf32>
    %91 = arith.addf %1, %90 : vector<8x32xf32>
    %c0_40 = arith.constant 0 : index
    %c0_41 = arith.constant 0 : index
    %92 = vector.load %arg9[%c0_40, %c0_41] : memref<1x32xf32, #tpu.memory_space<vmem>>, vector<1x32xf32>
    %c0_42 = arith.constant 0 : index
    %c0_43 = arith.constant 0 : index
    %93 = vector.load %arg10[%c0_42, %c0_43] : memref<1x32xf32, #tpu.memory_space<vmem>>, vector<1x32xf32>
    %cst_44 = arith.constant dense<0.000000e+00> : vector<8xf32>
    %94 = vector.multi_reduction <add>, %91, %cst_44 [1] : vector<8x32xf32> to vector<8xf32>
    %95 = vector.shape_cast %94 : vector<8xf32> to vector<8x1xf32>
    %cst_45 = arith.constant 3.200000e+01 : f32
    %96 = vector.broadcast %cst_45 : f32 to vector<8x1xf32>
    %97 = arith.divf %95, %96 : vector<8x1xf32>
    %98 = vector.broadcast %97 : vector<8x1xf32> to vector<8x32xf32>
    %99 = arith.subf %91, %98 : vector<8x32xf32>
    %100 = arith.mulf %99, %99 : vector<8x32xf32>
    %cst_46 = arith.constant dense<0.000000e+00> : vector<8xf32>
    %101 = vector.multi_reduction <add>, %100, %cst_46 [1] : vector<8x32xf32> to vector<8xf32>
    %102 = vector.shape_cast %101 : vector<8xf32> to vector<8x1xf32>
    %cst_47 = arith.constant 3.200000e+01 : f32
    %103 = vector.broadcast %cst_47 : f32 to vector<8x1xf32>
    %104 = arith.divf %102, %103 : vector<8x1xf32>
    %105 = vector.broadcast %97 : vector<8x1xf32> to vector<8x32xf32>
    %106 = arith.subf %91, %105 : vector<8x32xf32>
    %cst_48 = arith.constant 9.99999974E-6 : f32
    %107 = vector.broadcast %cst_48 : f32 to vector<8x1xf32>
    %108 = arith.addf %104, %107 : vector<8x1xf32>
    %109 = math.rsqrt %108 : vector<8x1xf32>
    %110 = vector.broadcast %109 : vector<8x1xf32> to vector<8x32xf32>
    %111 = arith.mulf %106, %110 : vector<8x32xf32>
    %112 = vector.broadcast %92 : vector<1x32xf32> to vector<8x32xf32>
    %113 = arith.mulf %111, %112 : vector<8x32xf32>
    %114 = vector.broadcast %93 : vector<1x32xf32> to vector<8x32xf32>
    %115 = arith.addf %113, %114 : vector<8x32xf32>
    %116 = arith.truncf %115 : vector<8x32xf32> to vector<8x32xbf16>
    %cst_49 = arith.constant 0.000000e+00 : f32
    %117 = vector.broadcast %cst_49 : f32 to vector<8x32xf32>
    %c0_50 = arith.constant 0 : index
    %c0_51 = arith.constant 0 : index
    %118 = vector.load %arg11[%c0_50, %c0_51] : memref<32x128xbf16, #tpu.memory_space<vmem>>, vector<32x128xbf16>
    %cst_52 = arith.constant dense<0.000000e+00> : vector<8x128xf32>
    %119 = tpu.matmul %116, %118, %cst_52 {dimension_numbers = #tpu.dot_dimension_numbers<[1], [0], [0], [1], [0, 0, 1, 1], [], []>} : vector<8x32xbf16>, vector<32x128xbf16>, vector<8x128xf32> -> vector<8x128xf32>
    %c0_53 = arith.constant 0 : index
    %c0_54 = arith.constant 0 : index
    %120 = vector.load %arg12[%c0_53, %c0_54] : memref<1x128xf32, #tpu.memory_space<vmem>>, vector<1x128xf32>
    %121 = vector.broadcast %120 : vector<1x128xf32> to vector<8x128xf32>
    %122 = arith.addf %119, %121 : vector<8x128xf32>
    %cst_55 = arith.constant 0.000000e+00 : f32
    %123 = vector.broadcast %cst_55 : f32 to vector<8x128xf32>
    %124 = arith.maximumf %122, %123 : vector<8x128xf32>
    %125 = arith.truncf %124 : vector<8x128xf32> to vector<8x128xbf16>
    %c0_56 = arith.constant 0 : index
    %c0_57 = arith.constant 0 : index
    %126 = vector.load %arg13[%c0_56, %c0_57] : memref<128x32xbf16, #tpu.memory_space<vmem>>, vector<128x32xbf16>
    %cst_58 = arith.constant dense<0.000000e+00> : vector<8x32xf32>
    %127 = tpu.matmul %125, %126, %cst_58 {dimension_numbers = #tpu.dot_dimension_numbers<[1], [0], [0], [1], [0, 0, 1, 1], [], []>} : vector<8x128xbf16>, vector<128x32xbf16>, vector<8x32xf32> -> vector<8x32xf32>
    %128 = arith.addf %117, %127 : vector<8x32xf32>
    %c0_59 = arith.constant 0 : index
    %c0_60 = arith.constant 0 : index
    %129 = vector.load %arg14[%c0_59, %c0_60] : memref<1x32xf32, #tpu.memory_space<vmem>>, vector<1x32xf32>
    %130 = vector.broadcast %129 : vector<1x32xf32> to vector<8x32xf32>
    %131 = arith.addf %128, %130 : vector<8x32xf32>
    %132 = arith.addf %115, %131 : vector<8x32xf32>
    %c0_61 = arith.constant 0 : index
    %c0_62 = arith.constant 0 : index
    %133 = vector.load %arg15[%c0_61, %c0_62] : memref<1x32xf32, #tpu.memory_space<vmem>>, vector<1x32xf32>
    %c0_63 = arith.constant 0 : index
    %c0_64 = arith.constant 0 : index
    %134 = vector.load %arg16[%c0_63, %c0_64] : memref<1x32xf32, #tpu.memory_space<vmem>>, vector<1x32xf32>
    %cst_65 = arith.constant dense<0.000000e+00> : vector<8xf32>
    %135 = vector.multi_reduction <add>, %132, %cst_65 [1] : vector<8x32xf32> to vector<8xf32>
    %136 = vector.shape_cast %135 : vector<8xf32> to vector<8x1xf32>
    %cst_66 = arith.constant 3.200000e+01 : f32
    %137 = vector.broadcast %cst_66 : f32 to vector<8x1xf32>
    %138 = arith.divf %136, %137 : vector<8x1xf32>
    %139 = vector.broadcast %138 : vector<8x1xf32> to vector<8x32xf32>
    %140 = arith.subf %132, %139 : vector<8x32xf32>
    %141 = arith.mulf %140, %140 : vector<8x32xf32>
    %cst_67 = arith.constant dense<0.000000e+00> : vector<8xf32>
    %142 = vector.multi_reduction <add>, %141, %cst_67 [1] : vector<8x32xf32> to vector<8xf32>
    %143 = vector.shape_cast %142 : vector<8xf32> to vector<8x1xf32>
    %cst_68 = arith.constant 3.200000e+01 : f32
    %144 = vector.broadcast %cst_68 : f32 to vector<8x1xf32>
    %145 = arith.divf %143, %144 : vector<8x1xf32>
    %146 = vector.broadcast %138 : vector<8x1xf32> to vector<8x32xf32>
    %147 = arith.subf %132, %146 : vector<8x32xf32>
    %cst_69 = arith.constant 9.99999974E-6 : f32
    %148 = vector.broadcast %cst_69 : f32 to vector<8x1xf32>
    %149 = arith.addf %145, %148 : vector<8x1xf32>
    %150 = math.rsqrt %149 : vector<8x1xf32>
    %151 = vector.broadcast %150 : vector<8x1xf32> to vector<8x32xf32>
    %152 = arith.mulf %147, %151 : vector<8x32xf32>
    %153 = vector.broadcast %133 : vector<1x32xf32> to vector<8x32xf32>
    %154 = arith.mulf %152, %153 : vector<8x32xf32>
    %155 = vector.broadcast %134 : vector<1x32xf32> to vector<8x32xf32>
    %156 = arith.addf %154, %155 : vector<8x32xf32>
    %c0_70 = arith.constant 0 : index
    %c0_71 = arith.constant 0 : index
    %c0_72 = arith.constant 0 : index
    %157 = vector.load %arg17[%c0_70, %c0_71, %c0_72] : memref<1x8x32xf32, #tpu.memory_space<vmem>>, vector<1x8x32xf32>
    %158 = vector.shape_cast %157 : vector<1x8x32xf32> to vector<8x32xf32>
    %159 = vector.shape_cast %156 : vector<8x32xf32> to vector<1x8x32xf32>
    tpu.vector_store %arg17[%c0_70, %c0_71, %c0_72], %159 {strides = array<i32>} : memref<1x8x32xf32, #tpu.memory_space<vmem>>, vector<1x8x32xf32>,
    return
  }
  func.func @transform_0(%arg0: i32, %arg1: i32) -> (i32, i32, i32) {
    %c0_i32 = arith.constant 0 : i32
    %c0_i32_0 = arith.constant 0 : i32
    return %arg0, %arg1, %c0_i32 : i32, i32, i32
  }
  func.func @transform_1(%arg0: i32, %arg1: i32) -> (i32, i32, i32) {
    %c0_i32 = arith.constant 0 : i32
    %c0_i32_0 = arith.constant 0 : i32
    %c0_i32_1 = arith.constant 0 : i32
    return %arg0, %c0_i32, %c0_i32_0 : i32, i32, i32
  }
  func.func @transform_2(%arg0: i32, %arg1: i32) -> (i32, i32, i32) {
    %c0_i32 = arith.constant 0 : i32
    %c0_i32_0 = arith.constant 0 : i32
    %c0_i32_1 = arith.constant 0 : i32
    return %arg0, %c0_i32, %c0_i32_0 : i32, i32, i32
  }
  func.func @transform_3(%arg0: i32, %arg1: i32) -> (i32, i32) {
    %c0_i32 = arith.constant 0 : i32
    %c0_i32_0 = arith.constant 0 : i32
    %c0_i32_1 = arith.constant 0 : i32
    return %c0_i32, %c0_i32_0 : i32, i32
  }
  func.func @transform_4(%arg0: i32, %arg1: i32) -> (i32, i32) {
    %c0_i32 = arith.constant 0 : i32
    %c0_i32_0 = arith.constant 0 : i32
    %c0_i32_1 = arith.constant 0 : i32
    return %c0_i32, %c0_i32_0 : i32, i32
  }
  func.func @transform_5(%arg0: i32, %arg1: i32) -> (i32, i32) {
    %c0_i32 = arith.constant 0 : i32
    %c0_i32_0 = arith.constant 0 : i32
    %c0_i32_1 = arith.constant 0 : i32
    return %c0_i32, %c0_i32_0 : i32, i32
  }
  func.func @transform_6(%arg0: i32, %arg1: i32) -> (i32, i32) {
    %c0_i32 = arith.constant 0 : i32
    %c0_i32_0 = arith.constant 0 : i32
    %c0_i32_1 = arith.constant 0 : i32
    return %c0_i32, %c0_i32_0 : i32, i32
  }
  func.func @transform_7(%arg0: i32, %arg1: i32) -> (i32, i32) {
    %c0_i32 = arith.constant 0 : i32
    %c0_i32_0 = arith.constant 0 : i32
    %c0_i32_1 = arith.constant 0 : i32
    return %c0_i32, %c0_i32_0 : i32, i32
  }
  func.func @transform_8(%arg0: i32, %arg1: i32) -> (i32, i32) {
    %c0_i32 = arith.constant 0 : i32
    %c0_i32_0 = arith.constant 0 : i32
    %c0_i32_1 = arith.constant 0 : i32
    return %c0_i32, %c0_i32_0 : i32, i32
  }
  func.func @transform_9(%arg0: i32, %arg1: i32) -> (i32, i32) {
    %c0_i32 = arith.constant 0 : i32
    %c0_i32_0 = arith.constant 0 : i32
    %c0_i32_1 = arith.constant 0 : i32
    return %c0_i32, %c0_i32_0 : i32, i32
  }
  func.func @transform_10(%arg0: i32, %arg1: i32) -> (i32, i32) {
    %c0_i32 = arith.constant 0 : i32
    %c0_i32_0 = arith.constant 0 : i32
    %c0_i32_1 = arith.constant 0 : i32
    return %c0_i32, %c0_i32_0 : i32, i32
  }
  func.func @transform_11(%arg0: i32, %arg1: i32) -> (i32, i32) {
    %c0_i32 = arith.constant 0 : i32
    %c0_i32_0 = arith.constant 0 : i32
    %c0_i32_1 = arith.constant 0 : i32
    return %c0_i32, %c0_i32_0 : i32, i32
  }
  func.func @transform_12(%arg0: i32, %arg1: i32) -> (i32, i32) {
    %c0_i32 = arith.constant 0 : i32
    %c0_i32_0 = arith.constant 0 : i32
    %c0_i32_1 = arith.constant 0 : i32
    return %c0_i32, %c0_i32_0 : i32, i32
  }
  func.func @transform_13(%arg0: i32, %arg1: i32) -> (i32, i32) {
    %c0_i32 = arith.constant 0 : i32
    %c0_i32_0 = arith.constant 0 : i32
    %c0_i32_1 = arith.constant 0 : i32
    return %c0_i32, %c0_i32_0 : i32, i32
  }
  func.func @transform_14(%arg0: i32, %arg1: i32) -> (i32, i32) {
    %c0_i32 = arith.constant 0 : i32
    %c0_i32_0 = arith.constant 0 : i32
    %c0_i32_1 = arith.constant 0 : i32
    return %c0_i32, %c0_i32_0 : i32, i32
  }
  func.func @transform_15(%arg0: i32, %arg1: i32) -> (i32, i32, i32) {
    %c0_i32 = arith.constant 0 : i32
    %c0_i32_0 = arith.constant 0 : i32
    return %arg0, %arg1, %c0_i32 : i32, i32, i32
  }
}

</mosaic_0001>

<bundles_post_ra>
// kernel: tpu_custom_call.1
= control target key start
LH: loop header
LB: loop body
LE: loop exit
PB: predicated region body
PF: predicated region fallthrough
CT: control target
= control target key end

     0   :  { %s2318_s0 = inlined_call_operand.vmem [shape: f32[2,8,32], index: 0, kind: input, shape index: {}]   ;;  %s2319_s1 = inlined_call_operand.vmem [shape: bf16[2,8,32], index: 1, kind: input, shape index: {}]   ;;  %s2320_s2 = inlined_call_operand.vmem [shape: bf16[2,8,32], index: 2, kind: input, shape index: {}]   ;;  %s2321_s3 = inlined_call_operand.vmem [shape: bf16[32,32], index: 3, kind: input, shape index: {}]   ;;  %s2322_s4 = inlined_call_operand.vmem [shape: f32[1,32], index: 4, kind: input, shape index: {}]   ;;  %s2323_s5 = inlined_call_operand.vmem [shape: bf16[32,32], index: 5, kind: input, shape index: {}]   ;;  %s2324_s6 = inlined_call_operand.vmem [shape: f32[1,32], index: 6, kind: input, shape index: {}]   ;;  %s2325_s7 = inlined_call_operand.vmem [shape: f32[1,32], index: 7, kind: input, shape index: {}]   ;;  %s2326_s8 = inlined_call_operand.vmem [shape: f32[1,32], index: 8, kind: input, shape index: {}]   ;;  %s2327_s9 = inlined_call_operand.vmem [shape: bf16[32,128], index: 9, kind: input, shape index: {}]   ;;  %s2328_s10 = inlined_call_operand.hbm [shape: f32[1,128], index: 10, kind: input, shape index: {}]   ;;  %s2329_s11 = inlined_call_operand.vmem [shape: bf16[128,32], index: 11, kind: input, shape index: {}]   ;;  %s2330_s12 = inlined_call_operand.vmem [shape: f32[1,32], index: 12, kind: input, shape index: {}]   ;;  %s2331_s13 = inlined_call_operand.vmem [shape: f32[1,32], index: 13, kind: input, shape index: {}]   ;;  %s2332_s14 = inlined_call_operand.vmem [shape: f32[1,32], index: 14, kind: input, shape index: {}]   ;;  %s2333_s15 = inlined_call_operand.hbm [shape: f32[2,8,32], index: 15, kind: output, shape index: {}]  }
   0x1   :  { %2341 = sst [smem:[#allocation16_spill]] %s2328_s10 }
   0x2   :  { %20 = vsyncpa [#allocation4], 0 }
   0x3   :  { %21 = vsyncpa [#allocation5], 0 }
   0x4   :  { %23 = vsyncpa [#allocation5 + $0x1], 0  ;;  %s2029_s18 = smov 0   ;;  %s2031_s19 = smov 0  }
   0x5   :  { %s2033_s20 = smov 0   ;;  %s2035_s21 = smov 0  }
   0x6   :  { %s2037_s22 = smov 0   ;;  %s2039_s23 = smov 0  }
   0x7 LB: > { %2342 = sst [smem:[#allocation9_spill]] %s1917_s18  ;;  %s1539_s24 = sadd.s32 4294967295, %s1937_s23   ;;  %s1937_s23 = sphi %s2039_s23, %s29_s23   ;;  %s1933_s22 = sphi %s2037_s22, %s2360_s22   ;;  %s1929_s21 = sphi %s2035_s21, %s2359_s21   ;;  %s1925_s20 = sphi %s2033_s20, %s2358_s20   ;;  %s1921_s19 = sphi %s2031_s19, %s2362_s19   ;;  %s1917_s18 = sphi %s2029_s18, %s2361_s18  }
   0x8   : > { %2343 = sst [smem:[#allocation10_spill]] %s1925_s20  ;;  %s1540_s25 = sadd.s32 4294967294, %s1937_s23  }
   0x9   : > { %2344 = sst [smem:[#allocation11_spill]] %s1933_s22  ;;  %s41_s26 = sadd.s32 1, %s1933_s22 }
   0xa   : > { %2345 = sst [smem:[#allocation12_spill]] %s1937_s23  ;;  %s382_s27 = sadd.s32 1, %s1925_s20 }
   0xb   : > { %p43_p0 = scmp.ge.s32.totalorder %s41_s26, 2  ;;  %p392_p1 = scmp.ne.s32.totalorder %s1925_s20, %s1921_s19 }
   0xc   : > { %p393_p2 = scmp.eq.s32.totalorder %s1539_s24, 1  ;;  %p398_p3 = scmp.ne.s32.totalorder %s1921_s19, %s1917_s18 }
   0xd   : > { %s2364_s26 = smov (%p43_p0, %s41_s26), 0  ;;  %p399_p5 = scmp.eq.s32.totalorder %s1540_s25, 1 }
   0xe   : > { %2346 = sst [smem:[#allocation13_spill]] %s2364_s26  ;;  %p2069_p4 = por %p393_p2, %p392_p1 }
   0xf   : > { %s377_s29 = ssub.s32 %s1933_s22, %s2364_s26  ;;  %p1541_p6 = scmp.ge.s32.totalorder %s1937_s23, 1 }
  0x10   : > { %p380_p7 = scmp.eq.s32.totalorder %s377_s29, 0  ;;  %p2076_p8 = por %p399_p5, %p398_p3 }
  0x11   : > { %p406_p9 = scmp.lt.s32.totalorder %s1937_s23, 3  ;;  %p2088_p11 = scmp.eq.s32.totalorder %s1539_s24, 0 }
  0x12   : > { %s2348_s30 = scalar_select %p2076_p8, 1, 0 }
  0x13   : > { %s2082_s16 = scalar_select %p380_p7, %s1925_s20, %s382_s27  }
  0x14   : > { %2349 = sst [smem:[#allocation14_spill]] %s2348_s30  ;;  %p2084_p10 = pnand %p1541_p6, %p406_p9 }
  0x15   : > { %2350 = sst [smem:[#allocation15_spill]] %s2082_s16  ;;  %s1939_s25 = smov [#allocation3]  }
  0x16   : > { %p1727_p12 = pneg %p2084_p10  ;;  %s440_s29 = sshll.u32 %s1939_s25, 4  ;;  %s441_s29 = int_to_ptr.vmem [resolvable:$true] %s440_s29 }
  0x17   : > { %s1842_s27 = scalar_lea.vmem %s441_s29, 16  ;;  %s1849_s26 = scalar_lea.vmem %s441_s29, 32 }
  0x18   : > { %p1728_p13 = pnand %p2088_p11, %p1727_p12  ;;  %p1843_p1 = scmp.ne.s32.totalorder %s441_s29, %s1842_s27 }
  0x19   : > { %p1850_p5 = scmp.lt.s32.totalorder %s441_s29, %s441_s29  ;;  %p1851_p6 = scmp.lt.s32.totalorder %s1849_s26, %s1842_s27 }
  0x1a   : > { %p1833_p0 = pneg %p1728_p13 }
  0x1b   : > { %p1852_p7 = por %p1851_p6, %p1850_p5 }
  0x1c   : > { %p1845_p2 = pnand %p1843_p1, %p1833_p0 }
  0x1e   : > { %p1846_p3 = pneg %p1845_p2 }
  0x20   : > { %p1853_p9 = pnand %p1852_p7, %p1846_p3 }
  0x22   : > { %1856 = shalt.err (!%p1853_p9)
}
  0x23   : > { %s2353_s10 = sld [smem:[#allocation16_spill]] }
  0x25   : > { %489 = sbr.rel (%p2084_p10) target bundleno = 2430 (0x97e), region = 80 }
  0x29   : > { %1730 = dma.hbm_to_vmem [thread:$0]  (!%p1728_p13), %s2353_s10, 16, %s441_s29, [#allocation4]  }
  0x2a   : > { %1908 = dma.done.wait (%p2088_p11), [#allocation4], 16  }
  0x2b   : > { %1910 = vsyncadd (%p2088_p11), [#allocation4], 4294967280  ;;  %p547_p12 = scmp.lt.s32.totalorder %s1929_s21, 1  ;;  %v1940_v0 = vmov 0.0   ;;  %vm1941_vm0 = vmmov 0   ;;  %v1795_v1 = vld [vmem:[%s2321_s3 + $0x8] sm:$0xff]  }
  0x2c   : > { %1629 = vmatprep.subr.bf16.mxu0 %v1940_v0  ;;  %1633 = vmatprep.mubr.msk.bf16.mxu0 %vm1941_vm0, %v1940_v0  ;;  %vm635_vm1 = vcmask 64512   ;;  %v1796_v2 = vld [vmem:[%s2321_s3] sm:$0xff]   ;;  %vm588_vm2 = vcmask 261120   ;;  %s1942_s20 = smov 120   ;;  %s1944_s16 = smov 104   ;;  %vm697_vm3 = vcmask 1043456  }
  0x2d   : > { %s2110_s22 = scalar_select %p547_p12, %s1929_s21, 1  ;;  %1649 = vmatprep.subr.bf16.mxu1 %v1940_v0  ;;  %1651 = vmatprep.mubr.msk.bf16.mxu1 %vm1941_vm0, %v1940_v0  ;;  %v1550_v10 = vld [vmem:[%s2322_s4] ss:$0 sm:$0xff]  ;;  %vm742_vm4 = vcmask 60416   ;;  %vm868_vm5 = vcmask 126016   ;;  %vm987_vm6 = vcmask 191616  }
  0x2e   : > { %1630 = vmatpush3.bf16.msra.mxu0 %v1795_v1  ;;  %vm1106_vm7 = vcmask 257216  }
  0x2f   : > { %s1547_s18 = sshll.u32 %s2110_s22, 3  ;;  %s1548_s26 = sshll.u32 %s2110_s22, 2  ;;  %1631 = vmatprep.subr.bf16.mxu0 %v1940_v0 }
  0x30   : > { %s553_s29 = scalar_lea.vmem %s2318_s0, %s1547_s18  ;;  %s557_s10 = scalar_lea.vmem %s2319_s1, %s1548_s26 }
  0x31   : > { %v2131_v3 = vld [vmem:[%s553_s29] sm:$0xff]  ;;  %s561_s25 = scalar_lea.vmem %s2320_s2, %s1548_s26  ;;  %s1945_s22 = smov 8  }
  0x32   : > { %v633_v4 = vld [vmem:[%s557_s10] sm:$0xf]  ;;  %v564_v7 = vpack.c.bf16 %v2131_v3, %v2131_v3  ;;  %1632 = vmatpush3.bf16.msra.mxu0 %v1796_v2  ;;  %s1943_s10 = smov 112   ;;  %s1589_s29 = sshll.u32 %s1929_s21, 7 }
  0x33   : > { %v1556_v5 = vcombine.low %v633_v4, %v633_v4  ;;  %v640_v6 = vsel %vm635_vm1, %v633_v4, 0  ;;  %1637 = vmatprep.subr.bf16.mxu0 %v1940_v0  ;;  %v634_v49 = vld [vmem:[%s561_s25] sm:$0xf]  ;;  %s1430_s23 = scalar_lea.hbm %s2333_s15, %s1589_s29  ;;  %s1948_s25 = smov [#allocation6]  }
  0x34   : > { %v699_v50 = vsel %vm697_vm3, %v634_v49, 0  ;;  %v1558_v51 = vcombine.low %v634_v49, %v634_v49 }
  0x35   : > { %750 = vrot.lane.b32.xlu0 %v1556_v5, %s1942_s20  ;;  %1634 = vmatmul.mubr.msk.bf16.vlgmr.msra.gmra.mxu0 %vm588_vm2, %v564_v7 }
  0x36   : > { %1638 = vmatpush3.bf16.xpose.msra.mxu0 %v640_v6  ;;  %1639 = vmatprep.mubr.msk.bf16.mxu0 %vm1941_vm0, %v1940_v0 }
  0x37   : > { %1643 = vmatprep.subr.bf16.mxu0 %v1940_v0  ;;  %872 = vrot.lane.b32.xlu1 %v1556_v5, %s1943_s10 }
  0xa7   : > { %v751_v8 = vpop.permute.xlu0 %750 }
  0xa8   : > { %v756_v9 = vsel %vm635_vm1, %v751_v8, 0 }
  0xa9   : > { %1650 = vmatpush3.bf16.xpose.msra.mxu1 %v756_v9  ;;  %v873_v17 = vpop.permute.xlu1 %872 }
  0xaa   : > { %1661 = vmatprep.subr.bf16.mxu1 %v1940_v0  ;;  %v878_v18 = vsel %vm635_vm1, %v873_v17, 0 }
  0xf5   : > { %v626_v11 = vpop.f32.mrf.mxu0 }
  0xf6   : > { %v627_v12 = vadd.f32 %v1550_v10, %v626_v11 }
  0xf7   : > { %v1635_v13 = vpop.f32.mrf.mxu0 }
  0xf8   : > { %v632_v14 = vpack.c.bf16 %v627_v12, %v627_v12 }
  0xf9   : > { %v629_v15 = vpop.f32.mrf.mxu0 }
  0xfa   : > { %870 = vrot.lane.b32.xlu1 %v632_v14, %s1943_s10  ;;  %745 = vrot.lane.b32.xlu0 %v632_v14, %s1942_s20 }
  0xfb   : > { %1640 = vmatmul.mubr.msk.bf16.vlgmr.msra.gmra.mxu0 %vm635_vm1, %v632_v14  ;;  %v1636_v16 = vpop.f32.mrf.mxu0 }
  0xfc   : > { %1645 = vmatprep.mubr.msk.bf16.mxu0 %vm1941_vm0, %v1940_v0  ;;  %1644 = vmatpush3.bf16.msra.mxu0 %v699_v50 }
  0xfd   : > { %1655 = vmatprep.subr.bf16.mxu0 %v1940_v0 }
  0xfe   : > { %989 = vrot.lane.b32.xlu1 %v632_v14, %s1944_s16  ;;  %991 = vrot.lane.b32.xlu0 %v1556_v5, %s1944_s16 }
 0x16c   : > { %v746_v19 = vpop.permute.xlu0 %745  ;;  %v871_v22 = vpop.permute.xlu1 %870 }
 0x16d   : > { %1652 = vmatmul.mubr.msk.bf16.vlgmr.msra.gmra.mxu1 %vm635_vm1, %v746_v19 }
 0x16e   : > { %1662 = vmatpush3.bf16.xpose.msra.mxu1 %v878_v18  ;;  %1663 = vmatprep.mubr.msk.bf16.mxu1 %vm1941_vm0, %v1940_v0 }
 0x16f   : > { %1673 = vmatprep.subr.bf16.mxu1 %v1940_v0 }
 0x170   : > { %v992_v20 = vpop.permute.xlu0 %991  ;;  %v990_v23 = vpop.permute.xlu1 %989 }
 0x171   : > { %v997_v21 = vsel %vm635_vm1, %v992_v20, 0 }
 0x175   : > { %1664 = vmatmul.mubr.msk.bf16.vlgmr.msra.gmra.mxu1 %vm635_vm1, %v871_v22 }
 0x176   : > { %1674 = vmatpush3.bf16.xpose.msra.mxu1 %v997_v21  ;;  %1675 = vmatprep.mubr.msk.bf16.mxu1 %vm1941_vm0, %v1940_v0 }
 0x177   : > { %1685 = vmatprep.subr.bf16.mxu1 %v1940_v0 }
 0x17d   : > { %1676 = vmatmul.mubr.msk.bf16.vlgmr.msra.gmra.mxu1 %vm635_vm1, %v990_v23 }
 0x17e   : > { %1689 = vmatprep.mubr.msk.bf16.mxu1 %vm1941_vm0, %v1940_v0 }
 0x1bb   : > { %v676_v24 = vpop.f32.mrf.mxu0 }
 0x1bc   : > { %v682_v25 = vsel %vm635_vm1, %v676_v24, -inf }
 0x1bd   : > { %683 = vmax.xlane.f32.xlu0 %v682_v25  ;;  %v1641_v26 = vpop.f32.mrf.mxu0 }
 0x1bf   : > { %v679_v27 = vpop.f32.mrf.mxu0 }
 0x1c1   : > { %v1642_v28 = vpop.f32.mrf.mxu0 }
 0x22d   : > { %v792_v29 = vpop.f32.mrf.mxu1 }
 0x22e   : > { %v798_v30 = vsel %vm635_vm1, %v792_v29, -inf }
 0x22f   : > { %799 = vmax.xlane.f32.xlu1 %v798_v30  ;;  %v1653_v31 = vpop.f32.mrf.mxu1 }
 0x231   : > { %v795_v32 = vpop.f32.mrf.mxu1 }
 0x233   : > { %v1654_v33 = vpop.f32.mrf.mxu1 }
 0x235   : > { %v914_v34 = vpop.f32.mrf.mxu1 }
 0x236   : > { %v920_v35 = vsel %vm635_vm1, %v914_v34, -inf }
 0x237   : > { %v1665_v36 = vpop.f32.mrf.mxu1  ;;  %921 = vmax.xlane.f32.xlu0 %v920_v35 }
 0x239   : > { %v917_v37 = vpop.f32.mrf.mxu1 }
 0x23a   : > { %v1799_v37 = vld [vmem:[%s2323_s5 + $0x8] sm:$0xff]  }
 0x23b   : > { %v1666_v38 = vpop.f32.mrf.mxu1  ;;  %1686 = vmatpush3.bf16.msra.mxu1 %v1799_v37 }
 0x23c   : > { %1687 = vmatprep.subr.bf16.mxu1 %v1940_v0 }
 0x23d   : > { %v1033_v39 = vpop.f32.mrf.mxu1 }
 0x23e   : > { %v1039_v40 = vsel %vm635_vm1, %v1033_v39, -inf }
 0x23f   : > { %v1677_v41 = vpop.f32.mrf.mxu1  ;;  %1040 = vmax.xlane.f32.xlu0 %v1039_v40 }
 0x241   : > { %v1036_v42 = vpop.f32.mrf.mxu1 }
 0x243   : > { %v1678_v43 = vpop.f32.mrf.mxu1 }
 0x246   : > { %v684_v44 = vpop.xlane.xlu0 %683 }
 0x247   : > { %v685_v45 = vsub.f32 %v676_v24, %v684_v44 }
 0x249   : > { %v686_v46 = vmul.f32 1.442695, %v685_v45 }
 0x24b   : > { %1811 = vpow2.f32 %v686_v46 }
 0x258   : > { %v1812_v47 = vpop.eup %1811 }
 0x259   : > { %v688_v48 = vsel %vm635_vm1, %v1812_v47, 0.0 }
 0x25a   : > { %689 = vadd.xlane.f32.xlu1 %v688_v48 }
 0x26b   : > { %813 = vrot.lane.b32.xlu1 %v1558_v51, %s1942_s20  ;;  %s1946_s20 = smov 16  }
 0x2b8   : > { %v800_v52 = vpop.xlane.xlu1 %799 }
 0x2b9   : > { %v801_v53 = vsub.f32 %v792_v29, %v800_v52 }
 0x2bb   : > { %v802_v54 = vmul.f32 1.442695, %v801_v53  ;;  %v1567_v53 = vld [vmem:[%s2324_s6] ss:$0 sm:$0xff] }
 0x2bd   : > { %1813 = vpow2.f32 %v802_v54 }
 0x2c0   : > { %v922_v55 = vpop.xlane.xlu0 %921 }
 0x2c1   : > { %v923_v56 = vsub.f32 %v914_v34, %v922_v55 }
 0x2c3   : > { %v924_v57 = vmul.f32 1.442695, %v923_v56 }
 0x2c5   : > { %1815 = vpow2.f32 %v924_v57 }
 0x2c8   : > { %v1041_v58 = vpop.xlane.xlu0 %1040 }
 0x2c9   : > { %v1042_v59 = vsub.f32 %v1033_v39, %v1041_v58  ;;  %v1800_v39 = vld [vmem:[%s2323_s5] sm:$0xff]  }
 0x2ca   : > { %v1814_v60 = vpop.eup %1813  ;;  %1688 = vmatpush3.bf16.msra.mxu1 %v1800_v39 }
 0x2cb   : > { %v1043_v61 = vmul.f32 1.442695, %v1042_v59  ;;  %v804_v62 = vsel %vm635_vm1, %v1814_v60, 0.0  ;;  %1701 = vmatprep.subr.bf16.mxu1 %v1940_v0 }
 0x2cc   : > { %805 = vadd.xlane.f32.xlu0 %v804_v62 }
 0x2cd   : > { %1817 = vpow2.f32 %v1043_v61 }
 0x2d2   : > { %v1816_v63 = vpop.eup %1815 }
 0x2d3   : > { %v926_v1 = vsel %vm635_vm1, %v1816_v63, 0.0 }
 0x2d4   : > { %927 = vadd.xlane.f32.xlu1 %v926_v1 }
 0x2da   : > { %v1818_v2 = vpop.eup %1817 }
 0x2db   : > { %v1045_v4 = vsel %vm635_vm1, %v1818_v2, 0.0 }
 0x2dc   : > { %1046 = vadd.xlane.f32.xlu0 %v1045_v4  ;;  %v1801_v4 = vld [vmem:[%s2327_s9 + $0x8] sm:$0xff]  }
 0x2e3   : > { %v690_v5 = vpop.xlane.xlu1 %689 }
 0x2e4   : > { %1819 = vrcp.f32 %v690_v5  ;;  %v1803_v5 = vld [vmem:[%s2329_s11 + $0x38] sm:$0xff]  }
 0x2e5   : > { %1051 = vrot.lane.b32.xlu1 %v1558_v51, %s1944_s16  ;;  %s544_s16 = sand.u32 1, %s1921_s19  }
 0x2e6   : > { %s1546_s18 = sshll.u32 %s544_s16, 3  ;;  %s1418_s30 = scalar_lea.sflag [#allocation5], %s544_s16 }
 0x2e7   : > { %v814_v7 = vpop.permute.xlu1 %813  ;;  %s546_s27 = scalar_lea.vmem [#allocation6], %s1546_s18 }
 0x2e8   : > { %v819_v10 = vsel %vm697_vm3, %v814_v7, 0  ;;  %v1805_v7 = vld [vmem:[%s2329_s11 + $0x28] sm:$0xff]   ;;  %s1432_s24 = sshll.u32 %s546_s27, 4  ;;  %s1433_s24 = int_to_ptr.vmem [resolvable:$true] %s1432_s24 }
 0x2e9   : > { %s1857_s17 = scalar_lea.vmem %s1433_s24, 128 }
 0x2ea   : > { %p1858_p10 = scmp.ne.s32.totalorder %s1433_s24, %s1857_s17 }
 0x2ec   : > { %p1859_p11 = pnand %p1858_p10, %p2069_p4 }
 0x2ee   : > { %p1860_p13 = pneg %p1859_p11 }
 0x2f1   : > { %v1820_v6 = vpop.eup %1819 }
 0x2f2   : > { %v692_v8 = vmul.f32 %v1820_v6, %v1812_v47  ;;  %932 = vrot.lane.b32.xlu0 %v1558_v51, %s1943_s10  ;;  %s1947_s10 = smov 24   ;;  %v1804_v6 = vld [vmem:[%s2329_s11 + $0x30] sm:$0xff]  }
 0x2f4   : > { %v693_v9 = vpack.c.bf16 %v692_v8, %v692_v8  ;;  %v1806_v8 = vld [vmem:[%s2329_s11 + $0x20] sm:$0xff]  }
 0x2f6   : > { %1646 = vmatmul.mubr.msk.bf16.vlgmr.msra.gmra.mxu0 %vm635_vm1, %v693_v9  ;;  %v1807_v9 = vld [vmem:[%s2329_s11 + $0x18] sm:$0xff]  }
 0x2f7   : > { %1656 = vmatpush3.bf16.msra.mxu0 %v819_v10  ;;  %1657 = vmatprep.mubr.msk.bf16.mxu0 %vm1941_vm0, %v1940_v0  ;;  %v1808_v10 = vld [vmem:[%s2329_s11 + $0x10] sm:$0xff]  }
 0x2f8   : > { %1667 = vmatprep.subr.bf16.mxu0 %v1940_v0 }
 0x355   : > { %v806_v11 = vpop.xlane.xlu0 %805 }
 0x356   : > { %1821 = vrcp.f32 %v806_v11 }
 0x35d   : > { %v928_v12 = vpop.xlane.xlu1 %927 }
 0x35e   : > { %1823 = vrcp.f32 %v928_v12 }
 0x361   : > { %v1052_v20 = vpop.permute.xlu1 %1051 }
 0x362   : > { %v1057_v23 = vsel %vm697_vm3, %v1052_v20, 0 }
 0x363   : > { %v1822_v13 = vpop.eup %1821 }
 0x364   : > { %v808_v14 = vmul.f32 %v1822_v13, %v1814_v60 }
 0x365   : > { %v1047_v15 = vpop.xlane.xlu0 %1046 }
 0x366   : > { %1825 = vrcp.f32 %v1047_v15  ;;  %v809_v16 = vpack.c.bf16 %v808_v14, %v808_v14  ;;  %v1571_v15 = vld [vmem:[%s2325_s7] ss:$0 sm:$0xff] }
 0x368   : > { %1658 = vmatmul.mubr.msk.bf16.vlgmr.msra.gmra.mxu0 %vm635_vm1, %v809_v16 }
 0x369   : > { %v933_v17 = vpop.permute.xlu0 %932  ;;  %1669 = vmatprep.mubr.msk.bf16.mxu0 %vm1941_vm0, %v1940_v0 }
 0x36a   : > { %v938_v18 = vsel %vm697_vm3, %v933_v17, 0  ;;  %v1572_v17 = vld [vmem:[%s2326_s8] ss:$0 sm:$0xff] }
 0x36b   : > { %v1824_v19 = vpop.eup %1823  ;;  %1668 = vmatpush3.bf16.msra.mxu0 %v938_v18 }
 0x36c   : > { %v930_v21 = vmul.f32 %v1824_v19, %v1816_v63  ;;  %1679 = vmatprep.subr.bf16.mxu0 %v1940_v0 }
 0x36e   : > { %v931_v22 = vpack.c.bf16 %v930_v21, %v930_v21  ;;  %v1809_v21 = vld [vmem:[%s2329_s11 + $0x8] sm:$0xff]  }
 0x370   : > { %1670 = vmatmul.mubr.msk.bf16.vlgmr.msra.gmra.mxu0 %vm635_vm1, %v931_v22  ;;  %v1810_v22 = vld [vmem:[%s2329_s11] sm:$0xff]  }
 0x371   : > { %1680 = vmatpush3.bf16.msra.mxu0 %v1057_v23  ;;  %1681 = vmatprep.mubr.msk.bf16.mxu0 %vm1941_vm0, %v1940_v0  ;;  %v1573_v23 = vld [vmem:[#allocation3] ss:$0 sm:$0xff] }
 0x372   : > { %1693 = vmatprep.subr.bf16.mxu0 %v1940_v0 }
 0x373   : > { %v1826_v24 = vpop.eup %1825 }
 0x374   : > { %v1049_v25 = vmul.f32 %v1826_v24, %v1818_v2 }
 0x376   : > { %v1050_v26 = vpack.c.bf16 %v1049_v25, %v1049_v25 }
 0x378   : > { %1682 = vmatmul.mubr.msk.bf16.vlgmr.msra.gmra.mxu0 %vm635_vm1, %v1050_v26 }
 0x379   : > { %1697 = vmatprep.mubr.msk.bf16.mxu0 %vm1941_vm0, %v1940_v0  ;;  %1694 = vmatpush3.bf16.msra.mxu0 %v1801_v4 }
 0x37a   : > { %1695 = vmatprep.subr.bf16.mxu0 %v1940_v0 }
 0x3b6   : > { %v735_v27 = vpop.f32.mrf.mxu0 }
 0x3b7   : > { %v741_v28 = vpack.c.bf16 %v735_v27, %v735_v27 }
 0x3b8   : > { %v1647_v29 = vpop.f32.mrf.mxu0 }
 0x3b9   : > { %743 = vst.msk [vmem:[#allocation2] sm:$0xf] %vm742_vm4, %v741_v28 }
 0x3ba   : > { %v738_v30 = vpop.f32.mrf.mxu0 }
 0x3bc   : > { %v1648_v31 = vpop.f32.mrf.mxu0 }
 0x3bd   : > { %v1577_v31 = vld [vmem:[%s2330_s12] ss:$0 sm:$0xff] }
 0x428   : > { %v855_v32 = vpop.f32.mrf.mxu0 }
 0x429   : > { %v1592_v33 = vpack.c.bf16 %v855_v32, %v855_v32 }
 0x42a   : > { %v1659_v34 = vpop.f32.mrf.mxu0 }
 0x42b   : > { %865 = vrot.lane.b32.xlu1 %v1592_v33, %s1945_s22  ;;  %s1861_s22 = sshll.u32 %s1948_s25, 4  ;;  %s1862_s22 = int_to_ptr.vmem [resolvable:$false] %s1861_s22 }
 0x42c   : > { %v858_v35 = vpop.f32.mrf.mxu0  ;;  %s1863_s21 = scalar_lea.vmem %s1862_s22, 256  ;;  %p1864_p0 = scmp.lt.s32.totalorder %s1433_s24, %s1862_s22 }
 0x42d   : > { %p1865_p1 = scmp.lt.s32.totalorder %s1863_s21, %s1857_s17 }
 0x42e   : > { %v1660_v36 = vpop.f32.mrf.mxu0 }
 0x42f   : > { %p1866_p2 = por %p1865_p1, %p1864_p0 }
 0x430   : > { %v974_v38 = vpop.f32.mrf.mxu0 }
 0x431   : > { %v1593_v40 = vpack.c.bf16 %v974_v38, %v974_v38  ;;  %p1867_p3 = pnand %p1866_p2, %p1860_p13 }
 0x432   : > { %v1671_v41 = vpop.f32.mrf.mxu0 }
 0x433   : > { %984 = vrot.lane.b32.xlu0 %v1593_v40, %s1946_s20 }
 0x434   : > { %v977_v42 = vpop.f32.mrf.mxu0 }
 0x436   : > { %v1672_v43 = vpop.f32.mrf.mxu0 }
 0x438   : > { %v1093_v44 = vpop.f32.mrf.mxu0 }
 0x439   : > { %v1594_v45 = vpack.c.bf16 %v1093_v44, %v1093_v44 }
 0x43a   : > { %v1683_v46 = vpop.f32.mrf.mxu0 }
 0x43b   : > { %1103 = vrot.lane.b32.xlu1 %v1594_v45, %s1947_s10 }
 0x43c   : > { %v1096_v47 = vpop.f32.mrf.mxu0 }
 0x43d   : > { %v1586_v47 = vld [vmem:[%s2331_s13] ss:$0 sm:$0xff] }
 0x43e   : > { %v1684_v48 = vpop.f32.mrf.mxu0 }
 0x49d   : > { %v866_v49 = vpop.permute.xlu1 %865 }
 0x49e   : > { %869 = vst.msk [vmem:[#allocation2] sm:$0xf] %vm868_vm5, %v866_v49  ;;  %v1587_v49 = vld [vmem:[%s2332_s14] ss:$0 sm:$0xff] }
 0x4a5   : > { %v985_v50 = vpop.permute.xlu0 %984 }
 0x4a6   : > { %988 = vst.msk [vmem:[#allocation2] sm:$0xf] %vm987_vm6, %v985_v50 }
 0x4ad   : > { %v1104_v51 = vpop.permute.xlu1 %1103 }
 0x4ae   : > { %1107 = vst.msk [vmem:[#allocation2] sm:$0xf] %vm1106_vm7, %v1104_v51 }
 0x4b5   : > { %v1108_v52 = vld [vmem:[#allocation2] sm:$0xf] }
 0x4b6   : > { %1690 = vmatmul.mubr.msk.bf16.vlgmr.msra.gmra.mxu1 %vm588_vm2, %v1108_v52 }
 0x4b7   : > { %1717 = vmatprep.mubr.msk.bf16.mxu1 %vm1941_vm0, %v1940_v0  ;;  %1702 = vmatpush3.bf16.msra.mxu1 %v1803_v5 }
 0x4b8   : > { %1703 = vmatprep.subr.bf16.mxu1 %v1940_v0 }
 0x4bb   : > { %1704 = vmatpush3.bf16.msra.mxu1 %v1804_v6 }
 0x4bc   : > { %1705 = vmatprep.subr.bf16.mxu1 %v1940_v0 }
 0x4bf   : > { %1706 = vmatpush3.bf16.msra.mxu1 %v1805_v7 }
 0x4c0   : > { %1707 = vmatprep.subr.bf16.mxu1 %v1940_v0 }
 0x4c3   : > { %1708 = vmatpush3.bf16.msra.mxu1 %v1806_v8 }
 0x4c4   : > { %1709 = vmatprep.subr.bf16.mxu1 %v1940_v0 }
 0x4c7   : > { %1710 = vmatpush3.bf16.msra.mxu1 %v1807_v9 }
 0x4c8   : > { %1711 = vmatprep.subr.bf16.mxu1 %v1940_v0 }
 0x4cb   : > { %1712 = vmatpush3.bf16.msra.mxu1 %v1808_v10 }
 0x4cc   : > { %1713 = vmatprep.subr.bf16.mxu1 %v1940_v0 }
 0x4cf   : > { %1714 = vmatpush3.bf16.msra.mxu1 %v1809_v21 }
 0x4d0   : > { %1715 = vmatprep.subr.bf16.mxu1 %v1940_v0 }
 0x4d3   : > { %1716 = vmatpush3.bf16.msra.mxu1 %v1810_v22 }
 0x576   : > { %v1169_v54 = vpop.f32.mrf.mxu1 }
 0x577   : > { %v1170_v55 = vadd.f32 %v1567_v53, %v1169_v54 }
 0x578   : > { %v1691_v56 = vpop.f32.mrf.mxu1 }
 0x579   : > { %v1175_v57 = vadd.f32 %v1170_v55, %v2131_v3  ;;  %v1802_v3 = vld [vmem:[%s2327_s9] sm:$0xff]  }
 0x57a   : > { %v1172_v58 = vpop.f32.mrf.mxu1  ;;  %1696 = vmatpush3.bf16.msra.mxu0 %v1802_v3 }
 0x57b   : > { %v1178_v59 = vsel %vm588_vm2, %v1175_v57, 0.0 }
 0x57c   : > { %1179 = vadd.xlane.f32.xlu0 %v1178_v59  ;;  %v1692_v60 = vpop.f32.mrf.mxu1 }
 0x605   : > { %v1180_v61 = vpop.xlane.xlu0 %1179 }
 0x606   : > { %v1182_v62 = vmul.f32 0.03125, %v1180_v61 }
 0x608   : > { %v1183_v63 = vsub.f32 %v1175_v57, %v1182_v62 }
 0x60a   : > { %v1184_v1 = vmul.f32 %v1183_v63, %v1183_v63 }
 0x60c   : > { %v1185_v2 = vsel %vm588_vm2, %v1184_v1, 0.0 }
 0x60d   : > { %1186 = vadd.xlane.f32.xlu1 %v1185_v2 }
 0x696   : > { %v1187_v11 = vpop.xlane.xlu1 %1186 }
 0x697   : > { %v1188_v12 = vmul.f32 0.03125, %v1187_v11 }
 0x699   : > { %v1189_v13 = vadd.f32 1e-05, %v1188_v12 }
 0x69b   : > { %1827 = vrsqrt.f32 %v1189_v13 }
 0x6a8   : > { %v1828_v14 = vpop.eup %1827 }
 0x6a9   : > { %v1191_v16 = vmul.f32 %v1828_v14, %v1183_v63 }
 0x6ab   : > { %v1198_v18 = vmul.f32 %v1571_v15, %v1191_v16 }
 0x6ad   : > { %v1205_v19 = vadd.f32 %v1572_v17, %v1198_v18 }
 0x6af   : > { %v1206_v20 = vpack.c.bf16 %v1205_v19, %v1205_v19 }
 0x6b1   : > { %1698 = vmatmul.mubr.msk.bf16.vlgmr.msra.gmra.mxu0 %vm588_vm2, %v1206_v20 }
 0x771   : > { %v1267_v24 = vpop.f32.mrf.mxu0 }
 0x772   : > { %v1268_v25 = vadd.f32 %v1573_v23, %v1267_v24 }
 0x773   : > { %v1699_v26 = vpop.f32.mrf.mxu0 }
 0x774   : > { %v1273_v27 = vmax.f32 %v1268_v25, 0.0 }
 0x775   : > { %v1270_v28 = vpop.f32.mrf.mxu0 }
 0x776   : > { %v1274_v29 = vpack.c.bf16 %v1273_v27, %v1273_v27 }
 0x777   : > { %v1700_v30 = vpop.f32.mrf.mxu0 }
 0x778   : > { %1718 = vmatmul.mubr.bf16.vlgmr.msra.gmra.mxu1 %v1274_v29 }
 0x838   : > { %v1380_v32 = vpop.f32.mrf.mxu1 }
 0x839   : > { %v1381_v0 = vadd.f32 %v1577_v31, %v1380_v32 }
 0x83a   : > { %v1719_v33 = vpop.f32.mrf.mxu1 }
 0x83b   : > { %v1386_v34 = vadd.f32 %v1381_v0, %v1205_v19 }
 0x83c   : > { %v1383_v35 = vpop.f32.mrf.mxu1 }
 0x83d   : > { %v1389_v36 = vsel %vm588_vm2, %v1386_v34, 0.0 }
 0x83e   : > { %1390 = vadd.xlane.f32.xlu0 %v1389_v36  ;;  %v1720_v37 = vpop.f32.mrf.mxu1 }
 0x8c7   : > { %v1391_v38 = vpop.xlane.xlu0 %1390 }
 0x8c8   : > { %v1392_v39 = vmul.f32 0.03125, %v1391_v38 }
 0x8ca   : > { %v1393_v40 = vsub.f32 %v1386_v34, %v1392_v39 }
 0x8cc   : > { %v1394_v41 = vmul.f32 %v1393_v40, %v1393_v40 }
 0x8ce   : > { %v1395_v42 = vsel %vm588_vm2, %v1394_v41, 0.0 }
 0x8cf   : > { %1396 = vadd.xlane.f32.xlu0 %v1395_v42 }
 0x958   : > { %v1397_v43 = vpop.xlane.xlu0 %1396 }
 0x959   : > { %v1398_v44 = vmul.f32 0.03125, %v1397_v43 }
 0x95b   : > { %v1399_v45 = vadd.f32 1e-05, %v1398_v44 }
 0x95d   : > { %1829 = vrsqrt.f32 %v1399_v45 }
 0x96a   : > { %v1830_v46 = vpop.eup %1829 }
 0x96b   : > { %v1401_v48 = vmul.f32 %v1830_v46, %v1393_v40 }
 0x96d   : > { %v1408_v50 = vmul.f32 %v1586_v47, %v1401_v48 }
 0x96f   : > { %v1415_v51 = vadd.f32 %v1587_v49, %v1408_v50 }
 0x971   : > { %1416 = vst.msk [vmem:[%s546_s27] sm:$0xff] %vm588_vm2, %v1415_v51 }
 0x972   : > { %1870 = shalt.err (!%p1867_p3)
}
 0x973   : > { %s1871_s18 = scalar_lea.hbm %s1430_s23, 128  ;;  %s1875_s29 = scalar_lea.hbm %s2333_s15, 256 }
 0x974   : > { %p1872_p5 = scmp.ne.s32.totalorder %s1430_s23, %s1871_s18  ;;  %p1876_p9 = scmp.lt.s32.totalorder %s1430_s23, %s2333_s15 }
 0x975   : > { %p1877_p12 = scmp.lt.s32.totalorder %s1875_s29, %s1871_s18 }
 0x976   : > { %p1873_p6 = pnand %p1872_p5, %p2069_p4 }
 0x977   : > { %p1878_p10 = por %p1877_p12, %p1876_p9 }
 0x978   : > { %p1874_p7 = pneg %p1873_p6 }
 0x97a   : > { %p1879_p11 = pnand %p1878_p10, %p1874_p7 }
 0x97c   : > { %1882 = shalt.err (!%p1879_p11)
}
 0x97d   : > { %1725 = dma.vmem_to_hbm [thread:$0]  (%p2069_p4), %s1433_s24, 128, %s1430_s23, %s1418_s30  }
 0x97e PF: > { %s2354_s10 = sld [smem:[#allocation12_spill]] }
 0x97f   : > { %s2355_s17 = sld [smem:[#allocation9_spill]] }
 0x984   : > { %p1737_p13 = scmp.ge.s32.totalorder %s2354_s10, 2 }
 0x985   : > { %s1444_s22 = sand.u32 1, %s2355_s17  }
 0x986   : > { %p1732_p0 = pnand %p1737_p13, %p2076_p8  ;;  %s1445_s21 = scalar_lea.sflag [#allocation5], %s1444_s22 }
 0x988   : > { %p1733_p1 = pneg %p1732_p0 }
 0x98a   : > { %1912 = dma.done.wait (%p1733_p1), %s1445_s21, 128  }
 0x98b   : > { %1914 = vsyncadd (%p1733_p1), %s1445_s21, 4294967168  ;;  %s29_s23 = sadd.s32 1, %s2354_s10   ;;  %s2357_s16 = sld [smem:[#allocation10_spill]] }
 0x98c   : > { %p26_p2 = scmp.ge.s32.totalorder %s29_s23, 4   ;;  %s2358_s20 = sld [smem:[#allocation15_spill]] }
 0x98d   : > { %s2359_s21 = sld [smem:[#allocation11_spill]]  ;;  %s2361_s18 = smov %s1921_s19 }
 0x98e   : > { %s2360_s22 = sld [smem:[#allocation13_spill]]  ;;  %28 = sbr.rel (!%p26_p2) target bundleno = 7 (0x7), region = 126 }
 0x991   : > { %s2362_s19 = smov %s2357_s16 }
 0x993   :  { %1450 = vsyncpa [#allocation4], 1 }
 0x994   :  { %1452 = vsyncpa [#allocation4 + $0x1], 1 }
 0x995   :  { %1453 = vsyncpa [#allocation5], 1 }
 0x996   :  { %1455 = vsyncpa [#allocation5 + $0x1], 1 }

// kernel: tpu_custom_call.1
= control target key start
LH: loop header
LB: loop body
LE: loop exit
PB: predicated region body
PF: predicated region fallthrough
CT: control target
= control target key end

     0   :  { %s2318_s0 = inlined_call_operand.vmem [shape: f32[2,8,32], index: 0, kind: input, shape index: {}]   ;;  %s2319_s1 = inlined_call_operand.vmem [shape: bf16[2,8,32], index: 1, kind: input, shape index: {}]   ;;  %s2320_s2 = inlined_call_operand.vmem [shape: bf16[2,8,32], index: 2, kind: input, shape index: {}]   ;;  %s2321_s3 = inlined_call_operand.vmem [shape: bf16[32,32], index: 3, kind: input, shape index: {}]   ;;  %s2322_s4 = inlined_call_operand.vmem [shape: f32[1,32], index: 4, kind: input, shape index: {}]   ;;  %s2323_s5 = inlined_call_operand.vmem [shape: bf16[32,32], index: 5, kind: input, shape index: {}]   ;;  %s2324_s6 = inlined_call_operand.vmem [shape: f32[1,32], index: 6, kind: input, shape index: {}]   ;;  %s2325_s7 = inlined_call_operand.vmem [shape: f32[1,32], index: 7, kind: input, shape index: {}]   ;;  %s2326_s8 = inlined_call_operand.vmem [shape: f32[1,32], index: 8, kind: input, shape index: {}]   ;;  %s2327_s9 = inlined_call_operand.vmem [shape: bf16[32,128], index: 9, kind: input, shape index: {}]   ;;  %s2328_s10 = inlined_call_operand.hbm [shape: f32[1,128], index: 10, kind: input, shape index: {}]   ;;  %s2329_s11 = inlined_call_operand.vmem [shape: bf16[128,32], index: 11, kind: input, shape index: {}]   ;;  %s2330_s12 = inlined_call_operand.vmem [shape: f32[1,32], index: 12, kind: input, shape index: {}]   ;;  %s2331_s13 = inlined_call_operand.vmem [shape: f32[1,32], index: 13, kind: input, shape index: {}]   ;;  %s2332_s14 = inlined_call_operand.vmem [shape: f32[1,32], index: 14, kind: input, shape index: {}]   ;;  %s2333_s15 = inlined_call_operand.hbm [shape: f32[2,8,32], index: 15, kind: output, shape index: {}]  }
   0x1   :  { %2341 = sst [smem:[#allocation16_spill]] %s2328_s10 }
   0x2   :  { %20 = vsyncpa [#allocation4], 0 }
   0x3   :  { %21 = vsyncpa [#allocation5], 0 }
   0x4   :  { %23 = vsyncpa [#allocation5 + $0x1], 0  ;;  %s2029_s18 = smov 0   ;;  %s2031_s19 = smov 0  }
   0x5   :  { %s2033_s20 = smov 0   ;;  %s2035_s21 = smov 0  }
   0x6   :  { %s2037_s22 = smov 0   ;;  %s2039_s23 = smov 0  }
   0x7 LB: > { %2342 = sst [smem:[#allocation9_spill]] %s1917_s18  ;;  %s1539_s24 = sadd.s32 4294967295, %s1937_s23   ;;  %s1937_s23 = sphi %s2039_s23, %s29_s23   ;;  %s1933_s22 = sphi %s2037_s22, %s2360_s22   ;;  %s1929_s21 = sphi %s2035_s21, %s2359_s21   ;;  %s1925_s20 = sphi %s2033_s20, %s2358_s20   ;;  %s1921_s19 = sphi %s2031_s19, %s2362_s19   ;;  %s1917_s18 = sphi %s2029_s18, %s2361_s18  }
   0x8   : > { %2343 = sst [smem:[#allocation10_spill]] %s1925_s20  ;;  %s1540_s25 = sadd.s32 4294967294, %s1937_s23  }
   0x9   : > { %2344 = sst [smem:[#allocation11_spill]] %s1933_s22  ;;  %s41_s26 = sadd.s32 1, %s1933_s22 }
   0xa   : > { %2345 = sst [smem:[#allocation12_spill]] %s1937_s23  ;;  %s382_s27 = sadd.s32 1, %s1925_s20 }
   0xb   : > { %p43_p0 = scmp.ge.s32.totalorder %s41_s26, 2  ;;  %p392_p1 = scmp.ne.s32.totalorder %s1925_s20, %s1921_s19 }
   0xc   : > { %p393_p2 = scmp.eq.s32.totalorder %s1539_s24, 1  ;;  %p398_p3 = scmp.ne.s32.totalorder %s1921_s19, %s1917_s18 }
   0xd   : > { %s2364_s26 = smov (%p43_p0, %s41_s26), 0  ;;  %p399_p5 = scmp.eq.s32.totalorder %s1540_s25, 1 }
   0xe   : > { %2346 = sst [smem:[#allocation13_spill]] %s2364_s26  ;;  %p2069_p4 = por %p393_p2, %p392_p1 }
   0xf   : > { %s377_s29 = ssub.s32 %s1933_s22, %s2364_s26  ;;  %p1541_p6 = scmp.ge.s32.totalorder %s1937_s23, 1 }
  0x10   : > { %p380_p7 = scmp.eq.s32.totalorder %s377_s29, 0  ;;  %p2076_p8 = por %p399_p5, %p398_p3 }
  0x11   : > { %p406_p9 = scmp.lt.s32.totalorder %s1937_s23, 3  ;;  %p2088_p11 = scmp.eq.s32.totalorder %s1539_s24, 0 }
  0x12   : > { %s2348_s30 = scalar_select %p2076_p8, 1, 0 }
  0x13   : > { %s2082_s16 = scalar_select %p380_p7, %s1925_s20, %s382_s27  }
  0x14   : > { %2349 = sst [smem:[#allocation14_spill]] %s2348_s30  ;;  %p2084_p10 = pnand %p1541_p6, %p406_p9 }
  0x15   : > { %2350 = sst [smem:[#allocation15_spill]] %s2082_s16  ;;  %s1939_s25 = smov [#allocation3]  }
  0x16   : > { %p1727_p12 = pneg %p2084_p10  ;;  %s440_s29 = sshll.u32 %s1939_s25, 4  ;;  %s441_s29 = int_to_ptr.vmem [resolvable:$true] %s440_s29 }
  0x17   : > { %s1842_s27 = scalar_lea.vmem %s441_s29, 16  ;;  %s1849_s26 = scalar_lea.vmem %s441_s29, 32 }
  0x18   : > { %p1728_p13 = pnand %p2088_p11, %p1727_p12  ;;  %p1843_p1 = scmp.ne.s32.totalorder %s441_s29, %s1842_s27 }
  0x19   : > { %p1850_p5 = scmp.lt.s32.totalorder %s441_s29, %s441_s29  ;;  %p1851_p6 = scmp.lt.s32.totalorder %s1849_s26, %s1842_s27 }
  0x1a   : > { %p1833_p0 = pneg %p1728_p13 }
  0x1b   : > { %p1852_p7 = por %p1851_p6, %p1850_p5 }
  0x1c   : > { %p1845_p2 = pnand %p1843_p1, %p1833_p0 }
  0x1e   : > { %p1846_p3 = pneg %p1845_p2 }
  0x20   : > { %p1853_p9 = pnand %p1852_p7, %p1846_p3 }
  0x22   : > { %1856 = shalt.err (!%p1853_p9)
}
  0x23   : > { %s2353_s10 = sld [smem:[#allocation16_spill]] }
  0x25   : > { %489 = sbr.rel (%p2084_p10) target bundleno = 2430 (0x97e), region = 80 }
  0x29   : > { %1730 = dma.hbm_to_vmem [thread:$0]  (!%p1728_p13), %s2353_s10, 16, %s441_s29, [#allocation4]  }
  0x2a   : > { %1908 = dma.done.wait (%p2088_p11), [#allocation4], 16  }
  0x2b   : > { %1910 = vsyncadd (%p2088_p11), [#allocation4], 4294967280  ;;  %p547_p12 = scmp.lt.s32.totalorder %s1929_s21, 1  ;;  %v1940_v0 = vmov 0.0   ;;  %vm1941_vm0 = vmmov 0   ;;  %v1795_v1 = vld [vmem:[%s2321_s3 + $0x8] sm:$0xff]  }
  0x2c   : > { %1629 = vmatprep.subr.bf16.mxu0 %v1940_v0  ;;  %1633 = vmatprep.mubr.msk.bf16.mxu0 %vm1941_vm0, %v1940_v0  ;;  %vm635_vm1 = vcmask 64512   ;;  %v1796_v2 = vld [vmem:[%s2321_s3] sm:$0xff]   ;;  %vm588_vm2 = vcmask 261120   ;;  %s1942_s20 = smov 120   ;;  %s1944_s16 = smov 104   ;;  %vm697_vm3 = vcmask 1043456  }
  0x2d   : > { %s2110_s22 = scalar_select %p547_p12, %s1929_s21, 1  ;;  %1649 = vmatprep.subr.bf16.mxu1 %v1940_v0  ;;  %1651 = vmatprep.mubr.msk.bf16.mxu1 %vm1941_vm0, %v1940_v0  ;;  %v1550_v10 = vld [vmem:[%s2322_s4] ss:$0 sm:$0xff]  ;;  %vm742_vm4 = vcmask 60416   ;;  %vm868_vm5 = vcmask 126016   ;;  %vm987_vm6 = vcmask 191616  }
  0x2e   : > { %1630 = vmatpush3.bf16.msra.mxu0 %v1795_v1  ;;  %vm1106_vm7 = vcmask 257216  }
  0x2f   : > { %s1547_s18 = sshll.u32 %s2110_s22, 3  ;;  %s1548_s26 = sshll.u32 %s2110_s22, 2  ;;  %1631 = vmatprep.subr.bf16.mxu0 %v1940_v0 }
  0x30   : > { %s553_s29 = scalar_lea.vmem %s2318_s0, %s1547_s18  ;;  %s557_s10 = scalar_lea.vmem %s2319_s1, %s1548_s26 }
  0x31   : > { %v2131_v3 = vld [vmem:[%s553_s29] sm:$0xff]  ;;  %s561_s25 = scalar_lea.vmem %s2320_s2, %s1548_s26  ;;  %s1945_s22 = smov 8  }
  0x32   : > { %v633_v4 = vld [vmem:[%s557_s10] sm:$0xf]  ;;  %v564_v7 = vpack.c.bf16 %v2131_v3, %v2131_v3  ;;  %1632 = vmatpush3.bf16.msra.mxu0 %v1796_v2  ;;  %s1943_s10 = smov 112   ;;  %s1589_s29 = sshll.u32 %s1929_s21, 7 }
  0x33   : > { %v1556_v5 = vcombine.low %v633_v4, %v633_v4  ;;  %v640_v6 = vsel %vm635_vm1, %v633_v4, 0  ;;  %1637 = vmatprep.subr.bf16.mxu0 %v1940_v0  ;;  %v634_v49 = vld [vmem:[%s561_s25] sm:$0xf]  ;;  %s1430_s23 = scalar_lea.hbm %s2333_s15, %s1589_s29  ;;  %s1948_s25 = smov [#allocation6]  }
  0x34   : > { %v699_v50 = vsel %vm697_vm3, %v634_v49, 0  ;;  %v1558_v51 = vcombine.low %v634_v49, %v634_v49 }
  0x35   : > { %750 = vrot.lane.b32.xlu0 %v1556_v5, %s1942_s20  ;;  %1634 = vmatmul.mubr.msk.bf16.vlgmr.msra.gmra.mxu0 %vm588_vm2, %v564_v7 }
  0x36   : > { %1638 = vmatpush3.bf16.xpose.msra.mxu0 %v640_v6  ;;  %1639 = vmatprep.mubr.msk.bf16.mxu0 %vm1941_vm0, %v1940_v0 }
  0x37   : > { %1643 = vmatprep.subr.bf16.mxu0 %v1940_v0  ;;  %872 = vrot.lane.b32.xlu1 %v1556_v5, %s1943_s10 }
  0xa7   : > { %v751_v8 = vpop.permute.xlu0 %750 }
  0xa8   : > { %v756_v9 = vsel %vm635_vm1, %v751_v8, 0 }
  0xa9   : > { %1650 = vmatpush3.bf16.xpose.msra.mxu1 %v756_v9  ;;  %v873_v17 = vpop.permute.xlu1 %872 }
  0xaa   : > { %1661 = vmatprep.subr.bf16.mxu1 %v1940_v0  ;;  %v878_v18 = vsel %vm635_vm1, %v873_v17, 0 }
  0xf5   : > { %v626_v11 = vpop.f32.mrf.mxu0 }
  0xf6   : > { %v627_v12 = vadd.f32 %v1550_v10, %v626_v11 }
  0xf7   : > { %v1635_v13 = vpop.f32.mrf.mxu0 }
  0xf8   : > { %v632_v14 = vpack.c.bf16 %v627_v12, %v627_v12 }
  0xf9   : > { %v629_v15 = vpop.f32.mrf.mxu0 }
  0xfa   : > { %870 = vrot.lane.b32.xlu1 %v632_v14, %s1943_s10  ;;  %745 = vrot.lane.b32.xlu0 %v632_v14, %s1942_s20 }
  0xfb   : > { %1640 = vmatmul.mubr.msk.bf16.vlgmr.msra.gmra.mxu0 %vm635_vm1, %v632_v14  ;;  %v1636_v16 = vpop.f32.mrf.mxu0 }
  0xfc   : > { %1645 = vmatprep.mubr.msk.bf16.mxu0 %vm1941_vm0, %v1940_v0  ;;  %1644 = vmatpush3.bf16.msra.mxu0 %v699_v50 }
  0xfd   : > { %1655 = vmatprep.subr.bf16.mxu0 %v1940_v0 }
  0xfe   : > { %989 = vrot.lane.b32.xlu1 %v632_v14, %s1944_s16  ;;  %991 = vrot.lane.b32.xlu0 %v1556_v5, %s1944_s16 }
 0x16c   : > { %v746_v19 = vpop.permute.xlu0 %745  ;;  %v871_v22 = vpop.permute.xlu1 %870 }
 0x16d   : > { %1652 = vmatmul.mubr.msk.bf16.vlgmr.msra.gmra.mxu1 %vm635_vm1, %v746_v19 }
 0x16e   : > { %1662 = vmatpush3.bf16.xpose.msra.mxu1 %v878_v18  ;;  %1663 = vmatprep.mubr.msk.bf16.mxu1 %vm1941_vm0, %v1940_v0 }
 0x16f   : > { %1673 = vmatprep.subr.bf16.mxu1 %v1940_v0 }
 0x170   : > { %v992_v20 = vpop.permute.xlu0 %991  ;;  %v990_v23 = vpop.permute.xlu1 %989 }
 0x171   : > { %v997_v21 = vsel %vm635_vm1, %v992_v20, 0 }
 0x175   : > { %1664 = vmatmul.mubr.msk.bf16.vlgmr.msra.gmra.mxu1 %vm635_vm1, %v871_v22 }
 0x176   : > { %1674 = vmatpush3.bf16.xpose.msra.mxu1 %v997_v21  ;;  %1675 = vmatprep.mubr.msk.bf16.mxu1 %vm1941_vm0, %v1940_v0 }
 0x177   : > { %1685 = vmatprep.subr.bf16.mxu1 %v1940_v0 }
 0x17d   : > { %1676 = vmatmul.mubr.msk.bf16.vlgmr.msra.gmra.mxu1 %vm635_vm1, %v990_v23 }
 0x17e   : > { %1689 = vmatprep.mubr.msk.bf16.mxu1 %vm1941_vm0, %v1940_v0 }
 0x1bb   : > { %v676_v24 = vpop.f32.mrf.mxu0 }
 0x1bc   : > { %v682_v25 = vsel %vm635_vm1, %v676_v24, -inf }
 0x1bd   : > { %683 = vmax.xlane.f32.xlu0 %v682_v25  ;;  %v1641_v26 = vpop.f32.mrf.mxu0 }
 0x1bf   : > { %v679_v27 = vpop.f32.mrf.mxu0 }
 0x1c1   : > { %v1642_v28 = vpop.f32.mrf.mxu0 }
 0x22d   : > { %v792_v29 = vpop.f32.mrf.mxu1 }
 0x22e   : > { %v798_v30 = vsel %vm635_vm1, %v792_v29, -inf }
 0x22f   : > { %799 = vmax.xlane.f32.xlu1 %v798_v30  ;;  %v1653_v31 = vpop.f32.mrf.mxu1 }
 0x231   : > { %v795_v32 = vpop.f32.mrf.mxu1 }
 0x233   : > { %v1654_v33 = vpop.f32.mrf.mxu1 }
 0x235   : > { %v914_v34 = vpop.f32.mrf.mxu1 }
 0x236   : > { %v920_v35 = vsel %vm635_vm1, %v914_v34, -inf }
 0x237   : > { %v1665_v36 = vpop.f32.mrf.mxu1  ;;  %921 = vmax.xlane.f32.xlu0 %v920_v35 }
 0x239   : > { %v917_v37 = vpop.f32.mrf.mxu1 }
 0x23a   : > { %v1799_v37 = vld [vmem:[%s2323_s5 + $0x8] sm:$0xff]  }
 0x23b   : > { %v1666_v38 = vpop.f32.mrf.mxu1  ;;  %1686 = vmatpush3.bf16.msra.mxu1 %v1799_v37 }
 0x23c   : > { %1687 = vmatprep.subr.bf16.mxu1 %v1940_v0 }
 0x23d   : > { %v1033_v39 = vpop.f32.mrf.mxu1 }
 0x23e   : > { %v1039_v40 = vsel %vm635_vm1, %v1033_v39, -inf }
 0x23f   : > { %v1677_v41 = vpop.f32.mrf.mxu1  ;;  %1040 = vmax.xlane.f32.xlu0 %v1039_v40 }
 0x241   : > { %v1036_v42 = vpop.f32.mrf.mxu1 }
 0x243   : > { %v1678_v43 = vpop.f32.mrf.mxu1 }
 0x246   : > { %v684_v44 = vpop.xlane.xlu0 %683 }
 0x247   : > { %v685_v45 = vsub.f32 %v676_v24, %v684_v44 }
 0x249   : > { %v686_v46 = vmul.f32 1.442695, %v685_v45 }
 0x24b   : > { %1811 = vpow2.f32 %v686_v46 }
 0x258   : > { %v1812_v47 = vpop.eup %1811 }
 0x259   : > { %v688_v48 = vsel %vm635_vm1, %v1812_v47, 0.0 }
 0x25a   : > { %689 = vadd.xlane.f32.xlu1 %v688_v48 }
 0x26b   : > { %813 = vrot.lane.b32.xlu1 %v1558_v51, %s1942_s20  ;;  %s1946_s20 = smov 16  }
 0x2b8   : > { %v800_v52 = vpop.xlane.xlu1 %799 }
 0x2b9   : > { %v801_v53 = vsub.f32 %v792_v29, %v800_v52 }
 0x2bb   : > { %v802_v54 = vmul.f32 1.442695, %v801_v53  ;;  %v1567_v53 = vld [vmem:[%s2324_s6] ss:$0 sm:$0xff] }
 0x2bd   : > { %1813 = vpow2.f32 %v802_v54 }
 0x2c0   : > { %v922_v55 = vpop.xlane.xlu0 %921 }
 0x2c1   : > { %v923_v56 = vsub.f32 %v914_v34, %v922_v55 }
 0x2c3   : > { %v924_v57 = vmul.f32 1.442695, %v923_v56 }
 0x2c5   : > { %1815 = vpow2.f32 %v924_v57 }
 0x2c8   : > { %v1041_v58 = vpop.xlane.xlu0 %1040 }
 0x2c9   : > { %v1042_v59 = vsub.f32 %v1033_v39, %v1041_v58  ;;  %v1800_v39 = vld [vmem:[%s2323_s5] sm:$0xff]  }
 0x2ca   : > { %v1814_v60 = vpop.eup %1813  ;;  %1688 = vmatpush3.bf16.msra.mxu1 %v1800_v39 }
 0x2cb   : > { %v1043_v61 = vmul.f32 1.442695, %v1042_v59  ;;  %v804_v62 = vsel %vm635_vm1, %v1814_v60, 0.0  ;;  %1701 = vmatprep.subr.bf16.mxu1 %v1940_v0 }
 0x2cc   : > { %805 = vadd.xlane.f32.xlu0 %v804_v62 }
 0x2cd   : > { %1817 = vpow2.f32 %v1043_v61 }
 0x2d2   : > { %v1816_v63 = vpop.eup %1815 }
 0x2d3   : > { %v926_v1 = vsel %vm635_vm1, %v1816_v63, 0.0 }
 0x2d4   : > { %927 = vadd.xlane.f32.xlu1 %v926_v1 }
 0x2da   : > { %v1818_v2 = vpop.eup %1817 }
 0x2db   : > { %v1045_v4 = vsel %vm635_vm1, %v1818_v2, 0.0 }
 0x2dc   : > { %1046 = vadd.xlane.f32.xlu0 %v1045_v4  ;;  %v1801_v4 = vld [vmem:[%s2327_s9 + $0x8] sm:$0xff]  }
 0x2e3   : > { %v690_v5 = vpop.xlane.xlu1 %689 }
 0x2e4   : > { %1819 = vrcp.f32 %v690_v5  ;;  %v1803_v5 = vld [vmem:[%s2329_s11 + $0x38] sm:$0xff]  }
 0x2e5   : > { %1051 = vrot.lane.b32.xlu1 %v1558_v51, %s1944_s16  ;;  %s544_s16 = sand.u32 1, %s1921_s19  }
 0x2e6   : > { %s1546_s18 = sshll.u32 %s544_s16, 3  ;;  %s1418_s30 = scalar_lea.sflag [#allocation5], %s544_s16 }
 0x2e7   : > { %v814_v7 = vpop.permute.xlu1 %813  ;;  %s546_s27 = scalar_lea.vmem [#allocation6], %s1546_s18 }
 0x2e8   : > { %v819_v10 = vsel %vm697_vm3, %v814_v7, 0  ;;  %v1805_v7 = vld [vmem:[%s2329_s11 + $0x28] sm:$0xff]   ;;  %s1432_s24 = sshll.u32 %s546_s27, 4  ;;  %s1433_s24 = int_to_ptr.vmem [resolvable:$true] %s1432_s24 }
 0x2e9   : > { %s1857_s17 = scalar_lea.vmem %s1433_s24, 128 }
 0x2ea   : > { %p1858_p10 = scmp.ne.s32.totalorder %s1433_s24, %s1857_s17 }
 0x2ec   : > { %p1859_p11 = pnand %p1858_p10, %p2069_p4 }
 0x2ee   : > { %p1860_p13 = pneg %p1859_p11 }
 0x2f1   : > { %v1820_v6 = vpop.eup %1819 }
 0x2f2   : > { %v692_v8 = vmul.f32 %v1820_v6, %v1812_v47  ;;  %932 = vrot.lane.b32.xlu0 %v1558_v51, %s1943_s10  ;;  %s1947_s10 = smov 24   ;;  %v1804_v6 = vld [vmem:[%s2329_s11 + $0x30] sm:$0xff]  }
 0x2f4   : > { %v693_v9 = vpack.c.bf16 %v692_v8, %v692_v8  ;;  %v1806_v8 = vld [vmem:[%s2329_s11 + $0x20] sm:$0xff]  }
 0x2f6   : > { %1646 = vmatmul.mubr.msk.bf16.vlgmr.msra.gmra.mxu0 %vm635_vm1, %v693_v9  ;;  %v1807_v9 = vld [vmem:[%s2329_s11 + $0x18] sm:$0xff]  }
 0x2f7   : > { %1656 = vmatpush3.bf16.msra.mxu0 %v819_v10  ;;  %1657 = vmatprep.mubr.msk.bf16.mxu0 %vm1941_vm0, %v1940_v0  ;;  %v1808_v10 = vld [vmem:[%s2329_s11 + $0x10] sm:$0xff]  }
 0x2f8   : > { %1667 = vmatprep.subr.bf16.mxu0 %v1940_v0 }
 0x355   : > { %v806_v11 = vpop.xlane.xlu0 %805 }
 0x356   : > { %1821 = vrcp.f32 %v806_v11 }
 0x35d   : > { %v928_v12 = vpop.xlane.xlu1 %927 }
 0x35e   : > { %1823 = vrcp.f32 %v928_v12 }
 0x361   : > { %v1052_v20 = vpop.permute.xlu1 %1051 }
 0x362   : > { %v1057_v23 = vsel %vm697_vm3, %v1052_v20, 0 }
 0x363   : > { %v1822_v13 = vpop.eup %1821 }
 0x364   : > { %v808_v14 = vmul.f32 %v1822_v13, %v1814_v60 }
 0x365   : > { %v1047_v15 = vpop.xlane.xlu0 %1046 }
 0x366   : > { %1825 = vrcp.f32 %v1047_v15  ;;  %v809_v16 = vpack.c.bf16 %v808_v14, %v808_v14  ;;  %v1571_v15 = vld [vmem:[%s2325_s7] ss:$0 sm:$0xff] }
 0x368   : > { %1658 = vmatmul.mubr.msk.bf16.vlgmr.msra.gmra.mxu0 %vm635_vm1, %v809_v16 }
 0x369   : > { %v933_v17 = vpop.permute.xlu0 %932  ;;  %1669 = vmatprep.mubr.msk.bf16.mxu0 %vm1941_vm0, %v1940_v0 }
 0x36a   : > { %v938_v18 = vsel %vm697_vm3, %v933_v17, 0  ;;  %v1572_v17 = vld [vmem:[%s2326_s8] ss:$0 sm:$0xff] }
 0x36b   : > { %v1824_v19 = vpop.eup %1823  ;;  %1668 = vmatpush3.bf16.msra.mxu0 %v938_v18 }
 0x36c   : > { %v930_v21 = vmul.f32 %v1824_v19, %v1816_v63  ;;  %1679 = vmatprep.subr.bf16.mxu0 %v1940_v0 }
 0x36e   : > { %v931_v22 = vpack.c.bf16 %v930_v21, %v930_v21  ;;  %v1809_v21 = vld [vmem:[%s2329_s11 + $0x8] sm:$0xff]  }
 0x370   : > { %1670 = vmatmul.mubr.msk.bf16.vlgmr.msra.gmra.mxu0 %vm635_vm1, %v931_v22  ;;  %v1810_v22 = vld [vmem:[%s2329_s11] sm:$0xff]  }
 0x371   : > { %1680 = vmatpush3.bf16.msra.mxu0 %v1057_v23  ;;  %1681 = vmatprep.mubr.msk.bf16.mxu0 %vm1941_vm0, %v1940_v0  ;;  %v1573_v23 = vld [vmem:[#allocation3] ss:$0 sm:$0xff] }
 0x372   : > { %1693 = vmatprep.subr.bf16.mxu0 %v1940_v0 }
 0x373   : > { %v1826_v24 = vpop.eup %1825 }
 0x374   : > { %v1049_v25 = vmul.f32 %v1826_v24, %v1818_v2 }
 0x376   : > { %v1050_v26 = vpack.c.bf16 %v1049_v25, %v1049_v25 }
 0x378   : > { %1682 = vmatmul.mubr.msk.bf16.vlgmr.msra.gmra.mxu0 %vm635_vm1, %v1050_v26 }
 0x379   : > { %1697 = vmatprep.mubr.msk.bf16.mxu0 %vm1941_vm0, %v1940_v0  ;;  %1694 = vmatpush3.bf16.msra.mxu0 %v1801_v4 }
 0x37a   : > { %1695 = vmatprep.subr.bf16.mxu0 %v1940_v0 }
 0x3b6   : > { %v735_v27 = vpop.f32.mrf.mxu0 }
 0x3b7   : > { %v741_v28 = vpack.c.bf16 %v735_v27, %v735_v27 }
 0x3b8   : > { %v1647_v29 = vpop.f32.mrf.mxu0 }
 0x3b9   : > { %743 = vst.msk [vmem:[#allocation2] sm:$0xf] %vm742_vm4, %v741_v28 }
 0x3ba   : > { %v738_v30 = vpop.f32.mrf.mxu0 }
 0x3bc   : > { %v1648_v31 = vpop.f32.mrf.mxu0 }
 0x3bd   : > { %v1577_v31 = vld [vmem:[%s2330_s12] ss:$0 sm:$0xff] }
 0x428   : > { %v855_v32 = vpop.f32.mrf.mxu0 }
 0x429   : > { %v1592_v33 = vpack.c.bf16 %v855_v32, %v855_v32 }
 0x42a   : > { %v1659_v34 = vpop.f32.mrf.mxu0 }
 0x42b   : > { %865 = vrot.lane.b32.xlu1 %v1592_v33, %s1945_s22  ;;  %s1861_s22 = sshll.u32 %s1948_s25, 4  ;;  %s1862_s22 = int_to_ptr.vmem [resolvable:$false] %s1861_s22 }
 0x42c   : > { %v858_v35 = vpop.f32.mrf.mxu0  ;;  %s1863_s21 = scalar_lea.vmem %s1862_s22, 256  ;;  %p1864_p0 = scmp.lt.s32.totalorder %s1433_s24, %s1862_s22 }
 0x42d   : > { %p1865_p1 = scmp.lt.s32.totalorder %s1863_s21, %s1857_s17 }
 0x42e   : > { %v1660_v36 = vpop.f32.mrf.mxu0 }
 0x42f   : > { %p1866_p2 = por %p1865_p1, %p1864_p0 }
 0x430   : > { %v974_v38 = vpop.f32.mrf.mxu0 }
 0x431   : > { %v1593_v40 = vpack.c.bf16 %v974_v38, %v974_v38  ;;  %p1867_p3 = pnand %p1866_p2, %p1860_p13 }
 0x432   : > { %v1671_v41 = vpop.f32.mrf.mxu0 }
 0x433   : > { %984 = vrot.lane.b32.xlu0 %v1593_v40, %s1946_s20 }
 0x434   : > { %v977_v42 = vpop.f32.mrf.mxu0 }
 0x436   : > { %v1672_v43 = vpop.f32.mrf.mxu0 }
 0x438   : > { %v1093_v44 = vpop.f32.mrf.mxu0 }
 0x439   : > { %v1594_v45 = vpack.c.bf16 %v1093_v44, %v1093_v44 }
 0x43a   : > { %v1683_v46 = vpop.f32.mrf.mxu0 }
 0x43b   : > { %1103 = vrot.lane.b32.xlu1 %v1594_v45, %s1947_s10 }
 0x43c   : > { %v1096_v47 = vpop.f32.mrf.mxu0 }
 0x43d   : > { %v1586_v47 = vld [vmem:[%s2331_s13] ss:$0 sm:$0xff] }
 0x43e   : > { %v1684_v48 = vpop.f32.mrf.mxu0 }
 0x49d   : > { %v866_v49 = vpop.permute.xlu1 %865 }
 0x49e   : > { %869 = vst.msk [vmem:[#allocation2] sm:$0xf] %vm868_vm5, %v866_v49  ;;  %v1587_v49 = vld [vmem:[%s2332_s14] ss:$0 sm:$0xff] }
 0x4a5   : > { %v985_v50 = vpop.permute.xlu0 %984 }
 0x4a6   : > { %988 = vst.msk [vmem:[#allocation2] sm:$0xf] %vm987_vm6, %v985_v50 }
 0x4ad   : > { %v1104_v51 = vpop.permute.xlu1 %1103 }
 0x4ae   : > { %1107 = vst.msk [vmem:[#allocation2] sm:$0xf] %vm1106_vm7, %v1104_v51 }
 0x4b5   : > { %v1108_v52 = vld [vmem:[#allocation2] sm:$0xf] }
 0x4b6   : > { %1690 = vmatmul.mubr.msk.bf16.vlgmr.msra.gmra.mxu1 %vm588_vm2, %v1108_v52 }
 0x4b7   : > { %1717 = vmatprep.mubr.msk.bf16.mxu1 %vm1941_vm0, %v1940_v0  ;;  %1702 = vmatpush3.bf16.msra.mxu1 %v1803_v5 }
 0x4b8   : > { %1703 = vmatprep.subr.bf16.mxu1 %v1940_v0 }
 0x4bb   : > { %1704 = vmatpush3.bf16.msra.mxu1 %v1804_v6 }
 0x4bc   : > { %1705 = vmatprep.subr.bf16.mxu1 %v1940_v0 }
 0x4bf   : > { %1706 = vmatpush3.bf16.msra.mxu1 %v1805_v7 }
 0x4c0   : > { %1707 = vmatprep.subr.bf16.mxu1 %v1940_v0 }
 0x4c3   : > { %1708 = vmatpush3.bf16.msra.mxu1 %v1806_v8 }
 0x4c4   : > { %1709 = vmatprep.subr.bf16.mxu1 %v1940_v0 }
 0x4c7   : > { %1710 = vmatpush3.bf16.msra.mxu1 %v1807_v9 }
 0x4c8   : > { %1711 = vmatprep.subr.bf16.mxu1 %v1940_v0 }
 0x4cb   : > { %1712 = vmatpush3.bf16.msra.mxu1 %v1808_v10 }
 0x4cc   : > { %1713 = vmatprep.subr.bf16.mxu1 %v1940_v0 }
 0x4cf   : > { %1714 = vmatpush3.bf16.msra.mxu1 %v1809_v21 }
 0x4d0   : > { %1715 = vmatprep.subr.bf16.mxu1 %v1940_v0 }
 0x4d3   : > { %1716 = vmatpush3.bf16.msra.mxu1 %v1810_v22 }
 0x576   : > { %v1169_v54 = vpop.f32.mrf.mxu1 }
 0x577   : > { %v1170_v55 = vadd.f32 %v1567_v53, %v1169_v54 }
 0x578   : > { %v1691_v56 = vpop.f32.mrf.mxu1 }
 0x579   : > { %v1175_v57 = vadd.f32 %v1170_v55, %v2131_v3  ;;  %v1802_v3 = vld [vmem:[%s2327_s9] sm:$0xff]  }
 0x57a   : > { %v1172_v58 = vpop.f32.mrf.mxu1  ;;  %1696 = vmatpush3.bf16.msra.mxu0 %v1802_v3 }
 0x57b   : > { %v1178_v59 = vsel %vm588_vm2, %v1175_v57, 0.0 }
 0x57c   : > { %1179 = vadd.xlane.f32.xlu0 %v1178_v59  ;;  %v1692_v60 = vpop.f32.mrf.mxu1 }
 0x605   : > { %v1180_v61 = vpop.xlane.xlu0 %1179 }
 0x606   : > { %v1182_v62 = vmul.f32 0.03125, %v1180_v61 }
 0x608   : > { %v1183_v63 = vsub.f32 %v1175_v57, %v1182_v62 }
 0x60a   : > { %v1184_v1 = vmul.f32 %v1183_v63, %v1183_v63 }
 0x60c   : > { %v1185_v2 = vsel %vm588_vm2, %v1184_v1, 0.0 }
 0x60d   : > { %1186 = vadd.xlane.f32.xlu1 %v1185_v2 }
 0x696   : > { %v1187_v11 = vpop.xlane.xlu1 %1186 }
 0x697   : > { %v1188_v12 = vmul.f32 0.03125, %v1187_v11 }
 0x699   : > { %v1189_v13 = vadd.f32 1e-05, %v1188_v12 }
 0x69b   : > { %1827 = vrsqrt.f32 %v1189_v13 }
 0x6a8   : > { %v1828_v14 = vpop.eup %1827 }
 0x6a9   : > { %v1191_v16 = vmul.f32 %v1828_v14, %v1183_v63 }
 0x6ab   : > { %v1198_v18 = vmul.f32 %v1571_v15, %v1191_v16 }
 0x6ad   : > { %v1205_v19 = vadd.f32 %v1572_v17, %v1198_v18 }
 0x6af   : > { %v1206_v20 = vpack.c.bf16 %v1205_v19, %v1205_v19 }
 0x6b1   : > { %1698 = vmatmul.mubr.msk.bf16.vlgmr.msra.gmra.mxu0 %vm588_vm2, %v1206_v20 }
 0x771   : > { %v1267_v24 = vpop.f32.mrf.mxu0 }
 0x772   : > { %v1268_v25 = vadd.f32 %v1573_v23, %v1267_v24 }
 0x773   : > { %v1699_v26 = vpop.f32.mrf.mxu0 }
 0x774   : > { %v1273_v27 = vmax.f32 %v1268_v25, 0.0 }
 0x775   : > { %v1270_v28 = vpop.f32.mrf.mxu0 }
 0x776   : > { %v1274_v29 = vpack.c.bf16 %v1273_v27, %v1273_v27 }
 0x777   : > { %v1700_v30 = vpop.f32.mrf.mxu0 }
 0x778   : > { %1718 = vmatmul.mubr.bf16.vlgmr.msra.gmra.mxu1 %v1274_v29 }
 0x838   : > { %v1380_v32 = vpop.f32.mrf.mxu1 }
 0x839   : > { %v1381_v0 = vadd.f32 %v1577_v31, %v1380_v32 }
 0x83a   : > { %v1719_v33 = vpop.f32.mrf.mxu1 }
 0x83b   : > { %v1386_v34 = vadd.f32 %v1381_v0, %v1205_v19 }
 0x83c   : > { %v1383_v35 = vpop.f32.mrf.mxu1 }
 0x83d   : > { %v1389_v36 = vsel %vm588_vm2, %v1386_v34, 0.0 }
 0x83e   : > { %1390 = vadd.xlane.f32.xlu0 %v1389_v36  ;;  %v1720_v37 = vpop.f32.mrf.mxu1 }
 0x8c7   : > { %v1391_v38 = vpop.xlane.xlu0 %1390 }
 0x8c8   : > { %v1392_v39 = vmul.f32 0.03125, %v1391_v38 }
 0x8ca   : > { %v1393_v40 = vsub.f32 %v1386_v34, %v1392_v39 }
 0x8cc   : > { %v1394_v41 = vmul.f32 %v1393_v40, %v1393_v40 }
 0x8ce   : > { %v1395_v42 = vsel %vm588_vm2, %v1394_v41, 0.0 }
 0x8cf   : > { %1396 = vadd.xlane.f32.xlu0 %v1395_v42 }
 0x958   : > { %v1397_v43 = vpop.xlane.xlu0 %1396 }
 0x959   : > { %v1398_v44 = vmul.f32 0.03125, %v1397_v43 }
 0x95b   : > { %v1399_v45 = vadd.f32 1e-05, %v1398_v44 }
 0x95d   : > { %1829 = vrsqrt.f32 %v1399_v45 }
 0x96a   : > { %v1830_v46 = vpop.eup %1829 }
 0x96b   : > { %v1401_v48 = vmul.f32 %v1830_v46, %v1393_v40 }
 0x96d   : > { %v1408_v50 = vmul.f32 %v1586_v47, %v1401_v48 }
 0x96f   : > { %v1415_v51 = vadd.f32 %v1587_v49, %v1408_v50 }
 0x971   : > { %1416 = vst.msk [vmem:[%s546_s27] sm:$0xff] %vm588_vm2, %v1415_v51 }
 0x972   : > { %1870 = shalt.err (!%p1867_p3)
}
 0x973   : > { %s1871_s18 = scalar_lea.hbm %s1430_s23, 128  ;;  %s1875_s29 = scalar_lea.hbm %s2333_s15, 256 }
 0x974   : > { %p1872_p5 = scmp.ne.s32.totalorder %s1430_s23, %s1871_s18  ;;  %p1876_p9 = scmp.lt.s32.totalorder %s1430_s23, %s2333_s15 }
 0x975   : > { %p1877_p12 = scmp.lt.s32.totalorder %s1875_s29, %s1871_s18 }
 0x976   : > { %p1873_p6 = pnand %p1872_p5, %p2069_p4 }
 0x977   : > { %p1878_p10 = por %p1877_p12, %p1876_p9 }
 0x978   : > { %p1874_p7 = pneg %p1873_p6 }
 0x97a   : > { %p1879_p11 = pnand %p1878_p10, %p1874_p7 }
 0x97c   : > { %1882 = shalt.err (!%p1879_p11)
}
 0x97d   : > { %1725 = dma.vmem_to_hbm [thread:$0]  (%p2069_p4), %s1433_s24, 128, %s1430_s23, %s1418_s30  }
 0x97e PF: > { %s2354_s10 = sld [smem:[#allocation12_spill]] }
 0x97f   : > { %s2355_s17 = sld [smem:[#allocation9_spill]] }
 0x984   : > { %p1737_p13 = scmp.ge.s32.totalorder %s2354_s10, 2 }
 0x985   : > { %s1444_s22 = sand.u32 1, %s2355_s17  }
 0x986   : > { %p1732_p0 = pnand %p1737_p13, %p2076_p8  ;;  %s1445_s21 = scalar_lea.sflag [#allocation5], %s1444_s22 }
 0x988   : > { %p1733_p1 = pneg %p1732_p0 }
 0x98a   : > { %1912 = dma.done.wait (%p1733_p1), %s1445_s21, 128  }
 0x98b   : > { %1914 = vsyncadd (%p1733_p1), %s1445_s21, 4294967168  ;;  %s29_s23 = sadd.s32 1, %s2354_s10   ;;  %s2357_s16 = sld [smem:[#allocation10_spill]] }
 0x98c   : > { %p26_p2 = scmp.ge.s32.totalorder %s29_s23, 4   ;;  %s2358_s20 = sld [smem:[#allocation15_spill]] }
 0x98d   : > { %s2359_s21 = sld [smem:[#allocation11_spill]]  ;;  %s2361_s18 = smov %s1921_s19 }
 0x98e   : > { %s2360_s22 = sld [smem:[#allocation13_spill]]  ;;  %28 = sbr.rel (!%p26_p2) target bundleno = 7 (0x7), region = 126 }
 0x991   : > { %s2362_s19 = smov %s2357_s16 }
 0x993   :  { %1450 = vsyncpa [#allocation4], 1 }
 0x994   :  { %1452 = vsyncpa [#allocation4 + $0x1], 1 }
 0x995   :  { %1453 = vsyncpa [#allocation5], 1 }
 0x996   :  { %1455 = vsyncpa [#allocation5 + $0x1], 1 }

</bundles_post_ra>
